<compile_context>
chip_gen: v6e
topology: v6e:2x2x1
jax: 0.10.0
libtpu: 0.0.40
codegen_flags: <defaults>
</compile_context>

<pallas_src>
import functools
import math

import jax
import jax.numpy as jnp
from jax.experimental import pallas as pl
from jax.experimental.pallas import tpu as pltpu


def _round_up(x: int, m: int) -> int:
    return ((x + m - 1) // m) * m


def _vmem_limit(need_bytes: int) -> int:
    # Never below the scoped default (32 MiB), never above a v7x-safe 48 MiB.
    return int(min(max(need_bytes + (8 << 20), 32 << 20), 48 << 20))


# --------------------------------------------------------------------------------------
# Kernel 1: W^T = sum_k coef[k] * basis_k^T
#   grid (in tiles, out tiles, k-chunks); k innermost "arbitrary"; f32 VMEM accumulator.
# --------------------------------------------------------------------------------------
def _materialize_wt_kernel(wcoef_ref, wbasis_ref, wt_ref, acc_ref, *, kc):
    kg = pl.program_id(2)

    @pl.when(kg == 0)
    def _init():
        acc_ref[...] = jnp.zeros_like(acc_ref)

    base = kg * kc
    # Two partial accumulators break the serial acc = acc + coef*tile VALU chain.
    acc0 = wcoef_ref[base] * wbasis_ref[0].astype(jnp.float32)
    acc1 = jnp.zeros_like(acc0)
    for kk in range(1, kc):
        term = wcoef_ref[base + kk] * wbasis_ref[kk].astype(jnp.float32)
        if kk % 2 == 0:
            acc0 = acc0 + term
        else:
            acc1 = acc1 + term
    acc_ref[...] += acc0 + acc1

    @pl.when(kg == pl.num_programs(2) - 1)
    def _finalize():
        wt_ref[...] = acc_ref[...].astype(wt_ref.dtype)


def materialize_weight_t(weight_coef_p, weight_basis_t_p, kc):
    """Build padded W^T (in_p, out_p) in bf16. Call once and reuse while coefs are fixed."""
    k_p, in_p, out_p = weight_basis_t_p.shape
    tk = math.gcd(in_p, 512)   # in_p is a multiple of 256 -> tk in {256, 512}
    tn = math.gcd(out_p, 512)
    # Keep >= 2 parallel slices for v7x megacore on tiny layers.
    if (in_p // tk) * (out_p // tn) < 2 and tn % 256 == 0:
        tn //= 2
    grid = (in_p // tk, out_p // tn, k_p // kc)

    bb = weight_basis_t_p.dtype.itemsize
    ob = weight_basis_t_p.dtype.itemsize
    need = 2 * kc * tk * tn * bb + 2 * tk * tn * ob + tk * tn * 4

    return pl.pallas_call(
        functools.partial(_materialize_wt_kernel, kc=kc),
        out_shape=jax.ShapeDtypeStruct((in_p, out_p), weight_basis_t_p.dtype),
        grid=grid,
        in_specs=[
            pl.BlockSpec(memory_space=pltpu.MemorySpace.SMEM),          # weight coefs
            pl.BlockSpec((kc, tk, tn), lambda i, j, k: (k, i, j)),      # basis chunk
        ],
        out_specs=pl.BlockSpec((tk, tn), lambda i, j, k: (i, j)),
        scratch_shapes=[pltpu.VMEM((tk, tn), jnp.float32)],
        compiler_params=pltpu.CompilerParams(
            dimension_semantics=("parallel", "parallel", "arbitrary"),
            vmem_limit_bytes=_vmem_limit(need),
        ),
    )(weight_coef_p, weight_basis_t_p)


# --------------------------------------------------------------------------------------
# Kernel 2: y = x @ W^T + bias  (bf16 operands, f32 accumulator, bias folded into init)
# --------------------------------------------------------------------------------------
def _gemm_bias_kernel(x_ref, wt_ref, bias_ref, o_ref, acc_ref):
    k = pl.program_id(2)

    @pl.when(k == 0)
    def _init():
        # Fold the (already reduced) bias row into the accumulator init.
        acc_ref[...] = jnp.broadcast_to(bias_ref[...], acc_ref.shape)

    acc_ref[...] += jnp.dot(x_ref[...], wt_ref[...], preferred_element_type=jnp.float32)

    @pl.when(k == pl.num_programs(2) - 1)
    def _finalize():
        o_ref[...] = acc_ref[...].astype(o_ref.dtype)


def silly_linear_apply(x, weight_t_p, bias_vec_p, out_features):
    """x: (*, in_features) f32/bf16; weight_t_p: (in_p, out_p) bf16; bias_vec_p: (1, out_p) f32."""
    in_p, out_p = weight_t_p.shape
    lead = x.shape[:-1]
    in_features = x.shape[-1]

    x2d = x.reshape(-1, in_features)
    m = x2d.shape[0]

    # M tiling: never collapse to tiny tiles, never pad excessively.
    if m >= 512:
        tm = 256
    elif m >= 128:
        tm = 128
    else:
        tm = _round_up(m, 16)            # bf16 sublane packing wants multiples of 16
    m_p = _round_up(m, tm)

    tn = math.gcd(out_p, 512)            # >= 256 because out_p is a multiple of 256
    tk = math.gcd(in_p, 512)
    # v7x megacore: keep at least 2 parallel output slices when possible.
    if (m_p // tm) * (out_p // tn) < 2 and tn % 256 == 0:
        tn //= 2

    grid = (m_p // tm, out_p // tn, in_p // tk)

    x_p = jnp.pad(x2d, ((0, m_p - m), (0, in_p - in_features))).astype(weight_t_p.dtype)
    out_dtype = x.dtype

    wb = weight_t_p.dtype.itemsize
    need = (2 * tm * tk * wb
            + 2 * tk * tn * wb
            + 2 * tn * 4
            + 2 * tm * tn * jnp.dtype(out_dtype).itemsize
            + tm * tn * 4)

    out_pad = pl.pallas_call(
        _gemm_bias_kernel,
        out_shape=jax.ShapeDtypeStruct((m_p, out_p), out_dtype),
        grid=grid,
        in_specs=[
            pl.BlockSpec((tm, tk), lambda i, j, k: (i, k)),       # x tile (bf16)
            pl.BlockSpec((tk, tn), lambda i, j, k: (k, j)),       # W^T tile (bf16)
            pl.BlockSpec((1, tn), lambda i, j, k: (0, j)),        # bias row (f32)
        ],
        out_specs=pl.BlockSpec((tm, tn), lambda i, j, k: (i, j)),
        scratch_shapes=[pltpu.VMEM((tm, tn), jnp.float32)],
        compiler_params=pltpu.CompilerParams(
            dimension_semantics=("parallel", "parallel", "arbitrary"),
            vmem_limit_bytes=_vmem_limit(need),
        ),
    )(x_p, weight_t_p, bias_vec_p)

    return out_pad[:m, :out_features].reshape(*lead, out_features)


@functools.partial(jax.jit, static_argnames=("out_features", "kc"))
def silly_linear_forward(x, weight_coef_p, weight_basis_t_p, bias_coef, bias_basis_p, *,
                         out_features, kc):
    # W^T is materialised once per forward; for repeated application with frozen
    # coefficients, call materialize_weight_t() once and reuse silly_linear_apply().
    wt_p = materialize_weight_t(weight_coef_p, weight_basis_t_p, kc)
    # Bias reduction is tiny (int_dim x out_p): do it once here instead of per-tile.
    bias_vec = jnp.einsum("k,ko->o", bias_coef,
                          bias_basis_p.astype(jnp.float32)).reshape(1, -1)
    return silly_linear_apply(x, wt_p, bias_vec, out_features)


# --------------------------------------------------------------------------------------
# Parameter construction (mirrors SillyLinear.__init__ + init_kaiming_uniform)
# --------------------------------------------------------------------------------------
def init_silly_linear(in_features, out_features, int_dim, seed, dtype=jnp.bfloat16):
    # Pad logical dims to multiples of 256 so GEMM tiles are always >= 256 wide.
    in_p = _round_up(in_features, 256)
    out_p = _round_up(out_features, 256)
    kc = min(int_dim, 8)
    k_p = _round_up(int_dim, kc)

    # Synthetic deterministic random bases (stand-in for RandumbTensor's seeded basis).
    basis_w = jax.random.normal(jax.random.PRNGKey(seed),
                                (int_dim, out_features, in_features), jnp.float32)
    basis_b = jax.random.normal(jax.random.PRNGKey(seed + 1),
                                (int_dim, out_features), jnp.float32)

    # init_kaiming_uniform on the coefficient vectors (fan_in / relu gain).
    fan_in = in_features
    gain = math.sqrt(2.0)
    out_std = gain / math.sqrt(fan_in)
    w_bound = math.sqrt(3.0) * math.sqrt(3.0 / int_dim) * out_std
    b_bound = math.sqrt(3.0) * math.sqrt(3.0 / int_dim) * out_std

    kcw, kcb = jax.random.split(jax.random.PRNGKey(seed + 1234))
    weight_coef = jax.random.uniform(kcw, (int_dim,), jnp.float32, -w_bound, w_bound)
    bias_coef = jax.random.uniform(kcb, (int_dim,), jnp.float32, -b_bound, b_bound)

    # Pre-transpose to (k, in, out) so the kernel builds W^T directly; pad once at init
    # (zeros, so padded K contributes exactly 0); store basis in bf16 (kernel 1 is
    # basis-read bound).  Pad k to a kc multiple with zero basis AND zero coef.
    wt_basis = jnp.transpose(basis_w, (0, 2, 1)).astype(dtype)
    wt_basis_p = jnp.pad(
        wt_basis,
        ((0, k_p - int_dim), (0, in_p - in_features), (0, out_p - out_features)))
    weight_coef_p = jnp.pad(weight_coef, (0, k_p - int_dim))
    bias_basis_p = jnp.pad(basis_b, ((0, 0), (0, out_p - out_features)))  # f32, tiny
    return weight_coef_p, wt_basis_p, bias_coef, bias_basis_p, kc


if __name__ == "__main__":
    in_features, out_features, int_dim, seed = 32, 16, 8, 0
    wcoef_p, wbasis_p, bcoef, bbasis_p, kc = init_silly_linear(
        in_features, out_features, int_dim, seed)

    # Input (*, H_in): batch=2, seq=8, hidden=32
    x = jax.random.normal(jax.random.PRNGKey(0), (2, 8, in_features), jnp.float32)

    y = silly_linear_forward(x, wcoef_p, wbasis_p, bcoef, bbasis_p,
                             out_features=out_features, kc=kc)
    y = jax.block_until_ready(y)
    assert y.shape == (2, 8, out_features)

    # Pure-JAX references (same padded parameters, logical slices).
    wt_f32 = jnp.einsum("k,kio->io", wcoef_p, wbasis_p.astype(jnp.float32))
    wt_f32 = wt_f32[:in_features, :out_features]
    b_ref = jnp.einsum("k,ko->o", bcoef, bbasis_p.astype(jnp.float32))[:out_features]
    x2d = x.reshape(-1, in_features)

    # (a) bf16-aware reference (quantise W^T and x like the kernel): tight tolerance.
    wt_q = wt_f32.astype(jnp.bfloat16).astype(jnp.float32)
    x_q = x2d.astype(jnp.bfloat16).astype(jnp.float32)
    y_ref_q = (x_q @ wt_q + b_ref).reshape(2, 8, out_features)
    assert jnp.allclose(y, y_ref_q, atol=2e-2, rtol=2e-2)

    # (b) full-f32 semantic reference: loose tolerance (bf16 operands on the MXU).
    y_ref = (x2d @ wt_f32 + b_ref).reshape(2, 8, out_features)
    assert jnp.allclose(y, y_ref, atol=1e-1, rtol=5e-2)

    print("KERNEL_OK")
</pallas_src>

<mosaic_0001>
module attributes {stable_mosaic.version = 11 : i64} {
  func.func @_materialize_wt_kernel(%arg0: i32, %arg1: i32, %arg2: i32, %arg3: memref<8xf32, #tpu.memory_space<smem>>, %arg4: memref<8x256x128xbf16, #tpu.memory_space<vmem>>, %arg5: memref<256x128xbf16, #tpu.memory_space<vmem>>, %arg6: memref<256x128xf32, #tpu.memory_space<vmem>>) attributes {dimension_semantics = [#tpu.dimension_semantics<parallel>, #tpu.dimension_semantics<parallel>, #tpu.dimension_semantics<arbitrary>], iteration_bounds = array<i64: 1, 2, 1>, scalar_prefetch = 0 : i64, scratch_operands = 1 : i64, tpu.core_type = #tpu.core_type<tc>, window_params = [{transform_indices = @transform_0, window_bounds = array<i64: 8>}, {transform_indices = @transform_1, window_bounds = array<i64: 8, 256, 128>}, {transform_indices = @transform_2, window_bounds = array<i64: 256, 128>}]} {
    %c0_i32 = arith.constant 0 : i32
    %0 = arith.cmpi eq, %arg2, %c0_i32 : i32
    %1 = arith.extui %0 : i1 to i32
    %c0_i32_0 = arith.constant 0 : i32
    %2 = arith.cmpi ne, %1, %c0_i32_0 : i32
    scf.if %2 {
      %cst_23 = arith.constant 0.000000e+00 : f32
      %82 = vector.broadcast %cst_23 : f32 to vector<256x128xf32>
      %c0_24 = arith.constant 0 : index
      %c0_25 = arith.constant 0 : index
      %83 = vector.load %arg6[%c0_24, %c0_25] : memref<256x128xf32, #tpu.memory_space<vmem>>, vector<256x128xf32>
      tpu.vector_store %arg6[%c0_24, %c0_25], %82 {strides = array<i32>} : memref<256x128xf32, #tpu.memory_space<vmem>>, vector<256x128xf32>,
    } else {
    }
    %c8_i32 = arith.constant 8 : i32
    %3 = arith.muli %arg2, %c8_i32 : i32
    %4 = arith.index_cast %3 : i32 to index
    %5 = memref.load %arg3[%4] : memref<8xf32, #tpu.memory_space<smem>>
    %c0 = arith.constant 0 : index
    %c0_1 = arith.constant 0 : index
    %c0_2 = arith.constant 0 : index
    %6 = vector.load %arg4[%c0, %c0_1, %c0_2] : memref<8x256x128xbf16, #tpu.memory_space<vmem>>, vector<1x256x128xbf16>
    %7 = vector.shape_cast %6 : vector<1x256x128xbf16> to vector<256x128xbf16>
    %8 = arith.extf %7 : vector<256x128xbf16> to vector<256x128xf32>
    %9 = vector.broadcast %5 : f32 to vector<256x128xf32>
    %10 = arith.mulf %9, %8 : vector<256x128xf32>
    %cst = arith.constant 0.000000e+00 : f32
    %11 = vector.broadcast %cst : f32 to vector<256x128xf32>
    %c1_i32 = arith.constant 1 : i32
    %12 = arith.addi %3, %c1_i32 : i32
    %13 = arith.index_cast %12 : i32 to index
    %14 = memref.load %arg3[%13] : memref<8xf32, #tpu.memory_space<smem>>
    %c1 = arith.constant 1 : index
    %c0_3 = arith.constant 0 : index
    %c0_4 = arith.constant 0 : index
    %15 = vector.load %arg4[%c1, %c0_3, %c0_4] : memref<8x256x128xbf16, #tpu.memory_space<vmem>>, vector<1x256x128xbf16>
    %16 = vector.shape_cast %15 : vector<1x256x128xbf16> to vector<256x128xbf16>
    %17 = arith.extf %16 : vector<256x128xbf16> to vector<256x128xf32>
    %18 = vector.broadcast %14 : f32 to vector<256x128xf32>
    %19 = arith.mulf %18, %17 : vector<256x128xf32>
    %20 = arith.addf %11, %19 : vector<256x128xf32>
    %c2_i32 = arith.constant 2 : i32
    %21 = arith.addi %3, %c2_i32 : i32
    %22 = arith.index_cast %21 : i32 to index
    %23 = memref.load %arg3[%22] : memref<8xf32, #tpu.memory_space<smem>>
    %c2 = arith.constant 2 : index
    %c0_5 = arith.constant 0 : index
    %c0_6 = arith.constant 0 : index
    %24 = vector.load %arg4[%c2, %c0_5, %c0_6] : memref<8x256x128xbf16, #tpu.memory_space<vmem>>, vector<1x256x128xbf16>
    %25 = vector.shape_cast %24 : vector<1x256x128xbf16> to vector<256x128xbf16>
    %26 = arith.extf %25 : vector<256x128xbf16> to vector<256x128xf32>
    %27 = vector.broadcast %23 : f32 to vector<256x128xf32>
    %28 = arith.mulf %27, %26 : vector<256x128xf32>
    %29 = arith.addf %10, %28 : vector<256x128xf32>
    %c3_i32 = arith.constant 3 : i32
    %30 = arith.addi %3, %c3_i32 : i32
    %31 = arith.index_cast %30 : i32 to index
    %32 = memref.load %arg3[%31] : memref<8xf32, #tpu.memory_space<smem>>
    %c3 = arith.constant 3 : index
    %c0_7 = arith.constant 0 : index
    %c0_8 = arith.constant 0 : index
    %33 = vector.load %arg4[%c3, %c0_7, %c0_8] : memref<8x256x128xbf16, #tpu.memory_space<vmem>>, vector<1x256x128xbf16>
    %34 = vector.shape_cast %33 : vector<1x256x128xbf16> to vector<256x128xbf16>
    %35 = arith.extf %34 : vector<256x128xbf16> to vector<256x128xf32>
    %36 = vector.broadcast %32 : f32 to vector<256x128xf32>
    %37 = arith.mulf %36, %35 : vector<256x128xf32>
    %38 = arith.addf %20, %37 : vector<256x128xf32>
    %c4_i32 = arith.constant 4 : i32
    %39 = arith.addi %3, %c4_i32 : i32
    %40 = arith.index_cast %39 : i32 to index
    %41 = memref.load %arg3[%40] : memref<8xf32, #tpu.memory_space<smem>>
    %c4 = arith.constant 4 : index
    %c0_9 = arith.constant 0 : index
    %c0_10 = arith.constant 0 : index
    %42 = vector.load %arg4[%c4, %c0_9, %c0_10] : memref<8x256x128xbf16, #tpu.memory_space<vmem>>, vector<1x256x128xbf16>
    %43 = vector.shape_cast %42 : vector<1x256x128xbf16> to vector<256x128xbf16>
    %44 = arith.extf %43 : vector<256x128xbf16> to vector<256x128xf32>
    %45 = vector.broadcast %41 : f32 to vector<256x128xf32>
    %46 = arith.mulf %45, %44 : vector<256x128xf32>
    %47 = arith.addf %29, %46 : vector<256x128xf32>
    %c5_i32 = arith.constant 5 : i32
    %48 = arith.addi %3, %c5_i32 : i32
    %49 = arith.index_cast %48 : i32 to index
    %50 = memref.load %arg3[%49] : memref<8xf32, #tpu.memory_space<smem>>
    %c5 = arith.constant 5 : index
    %c0_11 = arith.constant 0 : index
    %c0_12 = arith.constant 0 : index
    %51 = vector.load %arg4[%c5, %c0_11, %c0_12] : memref<8x256x128xbf16, #tpu.memory_space<vmem>>, vector<1x256x128xbf16>
    %52 = vector.shape_cast %51 : vector<1x256x128xbf16> to vector<256x128xbf16>
    %53 = arith.extf %52 : vector<256x128xbf16> to vector<256x128xf32>
    %54 = vector.broadcast %50 : f32 to vector<256x128xf32>
    %55 = arith.mulf %54, %53 : vector<256x128xf32>
    %56 = arith.addf %38, %55 : vector<256x128xf32>
    %c6_i32 = arith.constant 6 : i32
    %57 = arith.addi %3, %c6_i32 : i32
    %58 = arith.index_cast %57 : i32 to index
    %59 = memref.load %arg3[%58] : memref<8xf32, #tpu.memory_space<smem>>
    %c6 = arith.constant 6 : index
    %c0_13 = arith.constant 0 : index
    %c0_14 = arith.constant 0 : index
    %60 = vector.load %arg4[%c6, %c0_13, %c0_14] : memref<8x256x128xbf16, #tpu.memory_space<vmem>>, vector<1x256x128xbf16>
    %61 = vector.shape_cast %60 : vector<1x256x128xbf16> to vector<256x128xbf16>
    %62 = arith.extf %61 : vector<256x128xbf16> to vector<256x128xf32>
    %63 = vector.broadcast %59 : f32 to vector<256x128xf32>
    %64 = arith.mulf %63, %62 : vector<256x128xf32>
    %65 = arith.addf %47, %64 : vector<256x128xf32>
    %c7_i32 = arith.constant 7 : i32
    %66 = arith.addi %3, %c7_i32 : i32
    %67 = arith.index_cast %66 : i32 to index
    %68 = memref.load %arg3[%67] : memref<8xf32, #tpu.memory_space<smem>>
    %c7 = arith.constant 7 : index
    %c0_15 = arith.constant 0 : index
    %c0_16 = arith.constant 0 : index
    %69 = vector.load %arg4[%c7, %c0_15, %c0_16] : memref<8x256x128xbf16, #tpu.memory_space<vmem>>, vector<1x256x128xbf16>
    %70 = vector.shape_cast %69 : vector<1x256x128xbf16> to vector<256x128xbf16>
    %71 = arith.extf %70 : vector<256x128xbf16> to vector<256x128xf32>
    %72 = vector.broadcast %68 : f32 to vector<256x128xf32>
    %73 = arith.mulf %72, %71 : vector<256x128xf32>
    %74 = arith.addf %56, %73 : vector<256x128xf32>
    %c0_17 = arith.constant 0 : index
    %c0_18 = arith.constant 0 : index
    %75 = vector.load %arg6[%c0_17, %c0_18] : memref<256x128xf32, #tpu.memory_space<vmem>>, vector<256x128xf32>
    %76 = arith.addf %65, %74 : vector<256x128xf32>
    %77 = arith.addf %75, %76 : vector<256x128xf32>
    %c0_19 = arith.constant 0 : index
    %c0_20 = arith.constant 0 : index
    %78 = vector.load %arg6[%c0_19, %c0_20] : memref<256x128xf32, #tpu.memory_space<vmem>>, vector<256x128xf32>
    tpu.vector_store %arg6[%c0_19, %c0_20], %77 {strides = array<i32>} : memref<256x128xf32, #tpu.memory_space<vmem>>, vector<256x128xf32>,
    %c0_i32_21 = arith.constant 0 : i32
    %79 = arith.cmpi eq, %arg2, %c0_i32_21 : i32
    %80 = arith.extui %79 : i1 to i32
    %c0_i32_22 = arith.constant 0 : i32
    %81 = arith.cmpi ne, %80, %c0_i32_22 : i32
    scf.if %81 {
      %c0_23 = arith.constant 0 : index
      %c0_24 = arith.constant 0 : index
      %82 = vector.load %arg6[%c0_23, %c0_24] : memref<256x128xf32, #tpu.memory_space<vmem>>, vector<256x128xf32>
      %83 = arith.truncf %82 : vector<256x128xf32> to vector<256x128xbf16>
      %c0_25 = arith.constant 0 : index
      %c0_26 = arith.constant 0 : index
      %84 = vector.load %arg5[%c0_25, %c0_26] : memref<256x128xbf16, #tpu.memory_space<vmem>>, vector<256x128xbf16>
      tpu.vector_store %arg5[%c0_25, %c0_26], %83 {strides = array<i32>} : memref<256x128xbf16, #tpu.memory_space<vmem>>, vector<256x128xbf16>,
    } else {
    }
    return
  }
  func.func @transform_0(%arg0: i32, %arg1: i32, %arg2: i32) -> i32 {
    %c0_i32 = arith.constant 0 : i32
    %c0_i32_0 = arith.constant 0 : i32
    return %c0_i32 : i32
  }
  func.func @transform_1(%arg0: i32, %arg1: i32, %arg2: i32) -> (i32, i32, i32) {
    %c0_i32 = arith.constant 0 : i32
    return %arg2, %arg0, %arg1 : i32, i32, i32
  }
  func.func @transform_2(%arg0: i32, %arg1: i32, %arg2: i32) -> (i32, i32) {
    %c0_i32 = arith.constant 0 : i32
    return %arg0, %arg1 : i32, i32
  }
}

module attributes {stable_mosaic.version = 11 : i64} {
  func.func @_gemm_bias_kernel(%arg0: i32, %arg1: i32, %arg2: i32, %arg3: memref<16x256xbf16, #tpu.memory_space<vmem>>, %arg4: memref<256x128xbf16, #tpu.memory_space<vmem>>, %arg5: memref<1x128xf32, #tpu.memory_space<vmem>>, %arg6: memref<16x128xf32, #tpu.memory_space<vmem>>, %arg7: memref<16x128xf32, #tpu.memory_space<vmem>>) attributes {dimension_semantics = [#tpu.dimension_semantics<parallel>, #tpu.dimension_semantics<parallel>, #tpu.dimension_semantics<arbitrary>], iteration_bounds = array<i64: 1, 2, 1>, scalar_prefetch = 0 : i64, scratch_operands = 1 : i64, tpu.core_type = #tpu.core_type<tc>, window_params = [{transform_indices = @transform_0, window_bounds = array<i64: 16, 256>}, {transform_indices = @transform_1, window_bounds = array<i64: 256, 128>}, {transform_indices = @transform_2, window_bounds = array<i64: 1, 128>}, {transform_indices = @transform_3, window_bounds = array<i64: 16, 128>}]} {
    %c0_i32 = arith.constant 0 : i32
    %0 = arith.cmpi eq, %arg2, %c0_i32 : i32
    %1 = arith.extui %0 : i1 to i32
    %c0_i32_0 = arith.constant 0 : i32
    %2 = arith.cmpi ne, %1, %c0_i32_0 : i32
    scf.if %2 {
      %c0_10 = arith.constant 0 : index
      %c0_11 = arith.constant 0 : index
      %12 = vector.load %arg5[%c0_10, %c0_11] : memref<1x128xf32, #tpu.memory_space<vmem>>, vector<1x128xf32>
      %13 = vector.shape_cast %12 : vector<1x128xf32> to vector<1x128xf32>
      %14 = vector.broadcast %13 : vector<1x128xf32> to vector<16x128xf32>
      %c0_12 = arith.constant 0 : index
      %c0_13 = arith.constant 0 : index
      %15 = vector.load %arg7[%c0_12, %c0_13] : memref<16x128xf32, #tpu.memory_space<vmem>>, vector<16x128xf32>
      tpu.vector_store %arg7[%c0_12, %c0_13], %14 {strides = array<i32>} : memref<16x128xf32, #tpu.memory_space<vmem>>, vector<16x128xf32>,
    } else {
    }
    %c0 = arith.constant 0 : index
    %c0_1 = arith.constant 0 : index
    %3 = vector.load %arg7[%c0, %c0_1] : memref<16x128xf32, #tpu.memory_space<vmem>>, vector<16x128xf32>
    %c0_2 = arith.constant 0 : index
    %c0_3 = arith.constant 0 : index
    %4 = vector.load %arg3[%c0_2, %c0_3] : memref<16x256xbf16, #tpu.memory_space<vmem>>, vector<16x256xbf16>
    %c0_4 = arith.constant 0 : index
    %c0_5 = arith.constant 0 : index
    %5 = vector.load %arg4[%c0_4, %c0_5] : memref<256x128xbf16, #tpu.memory_space<vmem>>, vector<256x128xbf16>
    %cst = arith.constant dense<0.000000e+00> : vector<16x128xf32>
    %6 = tpu.matmul %4, %5, %cst {dimension_numbers = #tpu.dot_dimension_numbers<[1], [0], [0], [1], [0, 0, 1, 1], [], []>} : vector<16x256xbf16>, vector<256x128xbf16>, vector<16x128xf32> -> vector<16x128xf32>
    %7 = arith.addf %3, %6 : vector<16x128xf32>
    %c0_6 = arith.constant 0 : index
    %c0_7 = arith.constant 0 : index
    %8 = vector.load %arg7[%c0_6, %c0_7] : memref<16x128xf32, #tpu.memory_space<vmem>>, vector<16x128xf32>
    tpu.vector_store %arg7[%c0_6, %c0_7], %7 {strides = array<i32>} : memref<16x128xf32, #tpu.memory_space<vmem>>, vector<16x128xf32>,
    %c0_i32_8 = arith.constant 0 : i32
    %9 = arith.cmpi eq, %arg2, %c0_i32_8 : i32
    %10 = arith.extui %9 : i1 to i32
    %c0_i32_9 = arith.constant 0 : i32
    %11 = arith.cmpi ne, %10, %c0_i32_9 : i32
    scf.if %11 {
      %c0_10 = arith.constant 0 : index
      %c0_11 = arith.constant 0 : index
      %12 = vector.load %arg7[%c0_10, %c0_11] : memref<16x128xf32, #tpu.memory_space<vmem>>, vector<16x128xf32>
      %c0_12 = arith.constant 0 : index
      %c0_13 = arith.constant 0 : index
      %13 = vector.load %arg6[%c0_12, %c0_13] : memref<16x128xf32, #tpu.memory_space<vmem>>, vector<16x128xf32>
      tpu.vector_store %arg6[%c0_12, %c0_13], %12 {strides = array<i32>} : memref<16x128xf32, #tpu.memory_space<vmem>>, vector<16x128xf32>,
    } else {
    }
    return
  }
  func.func @transform_0(%arg0: i32, %arg1: i32, %arg2: i32) -> (i32, i32) {
    %c0_i32 = arith.constant 0 : i32
    return %arg0, %arg2 : i32, i32
  }
  func.func @transform_1(%arg0: i32, %arg1: i32, %arg2: i32) -> (i32, i32) {
    %c0_i32 = arith.constant 0 : i32
    return %arg2, %arg1 : i32, i32
  }
  func.func @transform_2(%arg0: i32, %arg1: i32, %arg2: i32) -> (i32, i32) {
    %c0_i32 = arith.constant 0 : i32
    %c0_i32_0 = arith.constant 0 : i32
    return %c0_i32, %arg1 : i32, i32
  }
  func.func @transform_3(%arg0: i32, %arg1: i32, %arg2: i32) -> (i32, i32) {
    %c0_i32 = arith.constant 0 : i32
    return %arg0, %arg1 : i32, i32
  }
}

</mosaic_0001>

<bundles_post_ra>
// kernel: silly_linear_forward.3
= control target key start
LH: loop header
LB: loop body
LE: loop exit
PB: predicated region body
PF: predicated region fallthrough
CT: control target
= control target key end

     0   :  { %s948_s12 = smov 0   ;;  %s950_s13 = smov 0   ;;  %s1121_s0 = inlined_call_operand.vmem [shape: bf16[16,256], index: 0, kind: input, shape index: {}]   ;;  %s1122_s1 = inlined_call_operand.vmem [shape: bf16[256,256], index: 1, kind: input, shape index: {}]   ;;  %s1123_s2 = inlined_call_operand.vmem [shape: f32[1,256], index: 2, kind: input, shape index: {}]   ;;  %s1124_s3 = inlined_call_operand.vmem [shape: f32[16,256], index: 3, kind: output, shape index: {}]  }
   0x1   :  { %s952_s14 = smov 0   ;;  %s954_s15 = smov 0  }
   0x2   :  { %s956_s16 = smov 0  }
   0x3 LB: > { %s28_s17 = sadd.s32 1, %s922_s15  ;;  %s774_s18 = sadd.s32 4294967295, %s926_s16   ;;  %s926_s16 = sphi %s956_s16, %s13_s16   ;;  %s922_s15 = sphi %s954_s15, %s1129_s15   ;;  %s918_s14 = sphi %s952_s14, %s1128_s14   ;;  %s914_s13 = sphi %s950_s13, %s1127_s13   ;;  %s910_s12 = sphi %s948_s12, %s1126_s12  }
   0x4   : > { %p30_p0 = scmp.ge.s32.totalorder %s28_s17, 2  ;;  %p76_p1 = scmp.ne.s32.totalorder %s914_s13, %s910_s12 }
   0x5   : > { %p77_p2 = scmp.eq.s32.totalorder %s926_s16, 0  ;;  %p134_p4 = scmp.eq.s32.totalorder %s774_s18, 1 }
   0x6   : > { %s1131_s17 = smov (%p30_p0, %s28_s17), 0  ;;  %s69_s20 = sadd.s32 1, %s914_s13 }
   0x7   : > { %p78_p3 = por %p77_p2, %p76_p1  ;;  %s65_s19 = ssub.s32 %s922_s15, %s1131_s17 }
   0x8   : > { %p67_p5 = scmp.eq.s32.totalorder %s65_s19, 0  ;;  %p983_p6 = por %p134_p4, %p76_p1 }
   0x9   : > { %p778_p7 = scmp.ge.s32.totalorder %s926_s16, 2 }
   0xa   : > { %s988_s22 = scalar_select %p67_p5, %s914_s13, %s69_s20  }
   0xb   : > { %171 = sbr.rel (%p778_p7) target bundleno = 41 (0x29), region = 20 }
  0x10   : > { %174 = sbr.rel (!%p78_p3) target bundleno = 41 (0x29), region = 24  ;;  %s176_s23 = sand.u32 (%p78_p3), 1, %s914_s13  }
  0x11   : > { %s780_s24 = sshll.u32 (%p78_p3), %s922_s15, 2  ;;  %s779_s25 = sshll.u32 (%p78_p3), %s176_s23, 7 }
  0x12   : > { %s996_s28 = scalar_lea.vmem (%p78_p3), %s1122_s1, %s780_s24  ;;  %s1000_s29 = scalar_lea.vmem (%p78_p3), [#allocation3], %s779_s25 }
  0x13   : > { %v200_v0 = vld [vmem:[%s996_s28] sm:$0xf] (%p78_p3)  ;;  %v202_v1 = vld [vmem:[%s996_s28 + $0x8] sm:$0xf] (%p78_p3)  ;;  %v204_v2 = vld [vmem:[%s996_s28 + $0x10] sm:$0xf] (%p78_p3) }
  0x14   : > { %201 = vst [vmem:[%s1000_s29] sm:$0xf] (%p78_p3), %v200_v0  ;;  %203 = vst [vmem:[%s1000_s29 + $0x4] sm:$0xf] (%p78_p3), %v202_v1  ;;  %v206_v3 = vld [vmem:[%s996_s28 + $0x18] sm:$0xf] (%p78_p3) }
  0x15   : > { %v208_v4 = vld [vmem:[%s996_s28 + $0x20] sm:$0xf]  ;;  %205 = vst [vmem:[%s1000_s29 + $0x8] sm:$0xf] %v204_v2  ;;  %207 = vst [vmem:[%s1000_s29 + $0xc] sm:$0xf] %v206_v3 }
  0x16   : > { %209 = vst [vmem:[%s1000_s29 + $0x10] sm:$0xf] %v208_v4  ;;  %v210_v5 = vld [vmem:[%s996_s28 + $0x28] sm:$0xf]  ;;  %v212_v6 = vld [vmem:[%s996_s28 + $0x30] sm:$0xf] }
  0x17   : > { %v214_v7 = vld [vmem:[%s996_s28 + $0x38] sm:$0xf]  ;;  %211 = vst [vmem:[%s1000_s29 + $0x14] sm:$0xf] %v210_v5  ;;  %213 = vst [vmem:[%s1000_s29 + $0x18] sm:$0xf] %v212_v6 }
  0x18   : > { %215 = vst [vmem:[%s1000_s29 + $0x1c] sm:$0xf] %v214_v7  ;;  %v216_v8 = vld [vmem:[%s996_s28 + $0x40] sm:$0xf]  ;;  %v218_v9 = vld [vmem:[%s996_s28 + $0x48] sm:$0xf] }
  0x19   : > { %v220_v10 = vld [vmem:[%s996_s28 + $0x50] sm:$0xf]  ;;  %217 = vst [vmem:[%s1000_s29 + $0x20] sm:$0xf] %v216_v8  ;;  %219 = vst [vmem:[%s1000_s29 + $0x24] sm:$0xf] %v218_v9 }
  0x1a   : > { %221 = vst [vmem:[%s1000_s29 + $0x28] sm:$0xf] %v220_v10  ;;  %v222_v11 = vld [vmem:[%s996_s28 + $0x58] sm:$0xf]  ;;  %v224_v12 = vld [vmem:[%s996_s28 + $0x60] sm:$0xf] }
  0x1b   : > { %v226_v13 = vld [vmem:[%s996_s28 + $0x68] sm:$0xf]  ;;  %223 = vst [vmem:[%s1000_s29 + $0x2c] sm:$0xf] %v222_v11  ;;  %225 = vst [vmem:[%s1000_s29 + $0x30] sm:$0xf] %v224_v12 }
  0x1c   : > { %227 = vst [vmem:[%s1000_s29 + $0x34] sm:$0xf] %v226_v13  ;;  %v228_v14 = vld [vmem:[%s996_s28 + $0x70] sm:$0xf]  ;;  %v230_v15 = vld [vmem:[%s996_s28 + $0x78] sm:$0xf] }
  0x1d   : > { %v232_v16 = vld [vmem:[%s996_s28 + $0x80] sm:$0xf]  ;;  %229 = vst [vmem:[%s1000_s29 + $0x38] sm:$0xf] %v228_v14  ;;  %231 = vst [vmem:[%s1000_s29 + $0x3c] sm:$0xf] %v230_v15 }
  0x1e   : > { %233 = vst [vmem:[%s1000_s29 + $0x40] sm:$0xf] %v232_v16  ;;  %v234_v17 = vld [vmem:[%s996_s28 + $0x88] sm:$0xf]  ;;  %v236_v18 = vld [vmem:[%s996_s28 + $0x90] sm:$0xf] }
  0x1f   : > { %v238_v19 = vld [vmem:[%s996_s28 + $0x98] sm:$0xf]  ;;  %235 = vst [vmem:[%s1000_s29 + $0x44] sm:$0xf] %v234_v17  ;;  %237 = vst [vmem:[%s1000_s29 + $0x48] sm:$0xf] %v236_v18 }
  0x20   : > { %239 = vst [vmem:[%s1000_s29 + $0x4c] sm:$0xf] %v238_v19  ;;  %v240_v20 = vld [vmem:[%s996_s28 + $0xa0] sm:$0xf]  ;;  %v242_v21 = vld [vmem:[%s996_s28 + $0xa8] sm:$0xf] }
  0x21   : > { %v244_v22 = vld [vmem:[%s996_s28 + $0xb0] sm:$0xf]  ;;  %241 = vst [vmem:[%s1000_s29 + $0x50] sm:$0xf] %v240_v20  ;;  %243 = vst [vmem:[%s1000_s29 + $0x54] sm:$0xf] %v242_v21 }
  0x22   : > { %245 = vst [vmem:[%s1000_s29 + $0x58] sm:$0xf] %v244_v22  ;;  %v246_v23 = vld [vmem:[%s996_s28 + $0xb8] sm:$0xf]  ;;  %v248_v24 = vld [vmem:[%s996_s28 + $0xc0] sm:$0xf] }
  0x23   : > { %v250_v25 = vld [vmem:[%s996_s28 + $0xc8] sm:$0xf]  ;;  %247 = vst [vmem:[%s1000_s29 + $0x5c] sm:$0xf] %v246_v23  ;;  %249 = vst [vmem:[%s1000_s29 + $0x60] sm:$0xf] %v248_v24 }
  0x24   : > { %251 = vst [vmem:[%s1000_s29 + $0x64] sm:$0xf] %v250_v25  ;;  %v252_v26 = vld [vmem:[%s996_s28 + $0xd0] sm:$0xf]  ;;  %v254_v27 = vld [vmem:[%s996_s28 + $0xd8] sm:$0xf] }
  0x25   : > { %v256_v28 = vld [vmem:[%s996_s28 + $0xe0] sm:$0xf]  ;;  %253 = vst [vmem:[%s1000_s29 + $0x68] sm:$0xf] %v252_v26  ;;  %255 = vst [vmem:[%s1000_s29 + $0x6c] sm:$0xf] %v254_v27 }
  0x26   : > { %257 = vst [vmem:[%s1000_s29 + $0x70] sm:$0xf] %v256_v28  ;;  %v258_v29 = vld [vmem:[%s996_s28 + $0xe8] sm:$0xf]  ;;  %v260_v30 = vld [vmem:[%s996_s28 + $0xf0] sm:$0xf] }
  0x27   : > { %v262_v31 = vld [vmem:[%s996_s28 + $0xf8] sm:$0xf]  ;;  %259 = vst [vmem:[%s1000_s29 + $0x74] sm:$0xf] %v258_v29  ;;  %261 = vst [vmem:[%s1000_s29 + $0x78] sm:$0xf] %v260_v30 }
  0x28   : > { %263 = vst [vmem:[%s1000_s29 + $0x7c] sm:$0xf] %v262_v31 }
  0x29 PF: > { %p781_p8 = scmp.ge.s32.totalorder %s926_s16, 1  ;;  %p356_p9 = scmp.lt.s32.totalorder %s926_s16, 3 }
  0x2b   : > { %p357_p10 = pnand %p781_p8, %p356_p9 }
  0x2c   : > { %s363_s30 = sand.u32 (!%p357_p10), 1, %s910_s12   ;;  %p411_p11 = scmp.lt.s32.totalorder (!%p357_p10), %s918_s14, 1 }
  0x2d   : > { %360 = sbr.rel (%p357_p10) target bundleno = 295 (0x127), region = 69  ;;  %s782_s4 = sshll.u32 (!%p357_p10), %s363_s30, 7 }
  0x2e   : > { %s1072_s7 = scalar_lea.vmem (!%p357_p10), [#allocation3], %s782_s4  ;;  %s783_s20 = sshll.u32 (!%p357_p10), %s363_s30, 4 }
  0x2f   : > { %s397_s23 = scalar_lea.vmem (!%p357_p10), [#allocation4], %s783_s20 }
  0x32   : > { %v887_v32 = vld [vmem:[%s1121_s0 + $0x4] ss:$8 sps:$4 sm:$0xff]   ;;  %v869_v33 = vld [vmem:[%s1072_s7 + $0x78] sm:$0xff]   ;;  %v871_v35 = vld [vmem:[%s1072_s7 + $0x70] sm:$0xff]   ;;  %s412_s10 = scalar_select %p411_p11, %s918_s14, 1 }
  0x33   : > { %603 = vmatprep.mubr.bf16.mxu0 %v887_v32  ;;  %v870_v34 = vld [vmem:[%s1072_s7 + $0x38] sm:$0xff]   ;;  %807 = vmatprep.subr.bf16.mxu0 %v869_v33  ;;  %v872_v36 = vld [vmem:[%s1072_s7 + $0x30] sm:$0xff]   ;;  %v873_v37 = vld [vmem:[%s1072_s7 + $0x68] sm:$0xff]   ;;  %s804_s24 = sshll.u32 (%p983_p6), %s918_s14, 3 }
  0x34   : > { %808 = vmatpush3.bf16.msra.mxu0 %v870_v34  ;;  %v874_v38 = vld [vmem:[%s1072_s7 + $0x28] sm:$0xff]   ;;  %v875_v39 = vld [vmem:[%s1072_s7 + $0x60] sm:$0xff]   ;;  %v877_v41 = vld [vmem:[%s1072_s7 + $0x58] sm:$0xff]   ;;  %s413_s19 = scalar_lea.vmem %s1123_s2, %s412_s10  ;;  %s634_s26 = scalar_lea.vmem (%p983_p6), %s1124_s3, %s804_s24 }
  0x35   : > { %809 = vmatprep.subr.bf16.mxu0 %v871_v35  ;;  %v876_v40 = vld [vmem:[%s1072_s7 + $0x20] sm:$0xff]   ;;  %v878_v42 = vld [vmem:[%s1072_s7 + $0x18] sm:$0xff]   ;;  %v879_v43 = vld [vmem:[%s1072_s7 + $0x50] sm:$0xff]  }
  0x36   : > { %v880_v44 = vld [vmem:[%s1072_s7 + $0x10] sm:$0xff]   ;;  %v881_v45 = vld [vmem:[%s1072_s7 + $0x48] sm:$0xff]   ;;  %v883_v47 = vld [vmem:[%s1072_s7 + $0x40] sm:$0xff]  }
  0x37   : > { %v882_v46 = vld [vmem:[%s1072_s7 + $0x8] sm:$0xff]   ;;  %v884_v48 = vld [vmem:[%s1072_s7] sm:$0xff]  }
  0x38   : > { %810 = vmatpush3.bf16.msra.mxu0 %v872_v36  ;;  %v885_v49 = vld [vmem:[%s1121_s0] ss:$8 sps:$4 sm:$0xff]  }
  0x39   : > { %811 = vmatprep.subr.bf16.mxu0 %v873_v37  ;;  %v784_v51 = vld [vmem:[%s413_s19] ss:$0 sm:$0xff] }
  0x3c   : > { %812 = vmatpush3.bf16.msra.mxu0 %v874_v38 }
  0x3d   : > { %813 = vmatprep.subr.bf16.mxu0 %v875_v39 }
  0x40   : > { %814 = vmatpush3.bf16.msra.mxu0 %v876_v40 }
  0x41   : > { %815 = vmatprep.subr.bf16.mxu0 %v877_v41 }
  0x44   : > { %816 = vmatpush3.bf16.msra.mxu0 %v878_v42 }
  0x45   : > { %817 = vmatprep.subr.bf16.mxu0 %v879_v43 }
  0x48   : > { %818 = vmatpush3.bf16.msra.mxu0 %v880_v44 }
  0x49   : > { %819 = vmatprep.subr.bf16.mxu0 %v881_v45 }
  0x4c   : > { %820 = vmatpush3.bf16.msra.mxu0 %v882_v46 }
  0x4d   : > { %821 = vmatprep.subr.bf16.mxu0 %v883_v47 }
  0x50   : > { %822 = vmatpush3.bf16.msra.mxu0 %v884_v48 }
  0x53   : > { %604 = vmatmul.mubr.bf16.vlgmr.msra.gmra.mxu0 %v885_v49 }
 0x113   : > { %v823_v50 = vpop.f32.mrf.mxu0 }
 0x115   : > { %v824_v52 = vpop.f32.mrf.mxu0 }
 0x116   : > { %v825_v53 = vadd.f32 %v824_v52, %v823_v50 }
 0x117   : > { %v826_v54 = vpop.f32.mrf.mxu0 }
 0x118   : > { %v612_v55 = vadd.f32 %v825_v53, %v784_v51 }
 0x119   : > { %v827_v56 = vpop.f32.mrf.mxu0 }
 0x11a   : > { %621 = vst [vmem:[%s397_s23] sm:$0xff] %v612_v55  ;;  %v828_v57 = vadd.f32 %v827_v56, %v826_v54  ;;  %629 = sbr.rel (!%p983_p6) target bundleno = 295 (0x127), region = 85 }
 0x11c   : > { %v613_v58 = vadd.f32 %v828_v57, %v784_v51 }
 0x11e   : > { %622 = vst [vmem:[%s397_s23 + $0x8] sm:$0xff] %v613_v58 }
 0x121   : > { %v665_v59 = vld [vmem:[%s397_s23] sm:$0xff] }
 0x122   : > { %666 = vst [vmem:[%s634_s26] sm:$0xff] %v665_v59 }
 0x125   : > { %v667_v60 = vld [vmem:[%s397_s23 + $0x8] sm:$0xff] }
 0x126   : > { %668 = vst [vmem:[%s634_s26 + $0x10] sm:$0xff] %v667_v60 }
 0x127 PF: > { %s13_s16 = sadd.s32 1, %s926_s16   ;;  %s1126_s12 = smov %s914_s13 }
 0x128   : > { %p10_p12 = scmp.ge.s32.totalorder %s13_s16, 4   ;;  %s1127_s13 = smov %s988_s22 }
 0x129   : > { %s1128_s14 = smov %s922_s15  ;;  %s1129_s15 = smov %s1131_s17 }
 0x12a   :  { %12 = sbr.rel (!%p10_p12) target bundleno = 3 (0x3), region = 160 }

// kernel: silly_linear_forward.2
= control target key start
LH: loop header
LB: loop body
LE: loop exit
PB: predicated region body
PF: predicated region fallthrough
CT: control target
= control target key end

     0   :  { %7 = vsyncpa [#allocation5], 0  ;;  %s3723_s0 = inlined_call_operand.vmem [shape: f32[8], index: 0, kind: input, shape index: {}]   ;;  %s3724_s1 = inlined_call_operand.hbm [shape: bf16[8,256,256], index: 1, kind: input, shape index: {}]   ;;  %s3725_s2 = inlined_call_operand.vmem [shape: bf16[256,256], index: 2, kind: output, shape index: {}]  }
   0x1   :  { %8 = vsyncpa [#allocation4], 0 }
   0x2   :  { %10 = vsyncpa [#allocation4 + $0x1], 0  ;;  %s3087_s9 = smov 0   ;;  %s3089_s10 = smov 0  }
   0x3   :  { %s3091_s11 = smov 0   ;;  %s3093_s12 = smov 0  }
   0x4   :  { %s3095_s13 = smov 0   ;;  %s3097_s14 = smov 0  }
   0x5 LB: > { %s1855_s15 = sadd.s32 4294967295, %s3065_s14   ;;  %s67_s16 = sadd.s32 1, %s3053_s11  ;;  %s3065_s14 = sphi %s3097_s14, %s16_s14   ;;  %s3061_s13 = sphi %s3095_s13, %s3741_s13   ;;  %s3057_s12 = sphi %s3093_s12, %s3740_s12   ;;  %s3053_s11 = sphi %s3091_s11, %s3739_s11   ;;  %s3049_s10 = sphi %s3089_s10, %s3738_s10   ;;  %s3045_s9 = sphi %s3087_s9, %s3737_s9  }
   0x6   : > { %p74_p0 = scmp.ne.s32.totalorder %s3053_s11, %s3049_s10  ;;  %p75_p1 = scmp.eq.s32.totalorder %s3065_s14, 0 }
   0x7   : > { %p80_p2 = scmp.ne.s32.totalorder %s3049_s10, %s3045_s9  ;;  %p3121_p3 = scmp.eq.s32.totalorder %s1855_s15, 0 }
   0x8   : > { %p3125_p4 = por %p75_p1, %p74_p0  ;;  %p106_p5 = scmp.eq.s32.totalorder %s1855_s15, 1 }
   0x9   : > { %p3131_p6 = por %p3121_p3, %p80_p2  ;;  %p1857_p7 = scmp.ge.s32.totalorder %s3065_s14, 1 }
   0xa   : > { %p3136_p8 = por %p106_p5, %p74_p0  ;;  %p119_p9 = scmp.lt.s32.totalorder %s3065_s14, 3 }
   0xb   : > { %s3730_s19 = scalar_select %p3131_p6, 1, 0 }
   0xc   : > { %s3731_s20 = scalar_select %p3136_p8, 1, 0 }
   0xd   : > { %s132_s23 = sshll.u32 %s3723_s0, 4  ;;  %p3144_p10 = pnand %p1857_p7, %p119_p9  ;;  %s133_s23 = int_to_ptr.vmem [resolvable:$true] %s132_s23 }
   0xe   : > { %p2914_p12 = scmp.lt.s32.totalorder %s3065_s14, 2  ;;  %s143_s25 = sand.u32 1, %s3053_s11  }
   0xf   : > { %s3732_s24 = scalar_select %p3144_p10, 1, 0 }
  0x10   : > { %p2905_p11 = pneg %p3144_p10  ;;  %p3156_p0 = pnand %p2914_p12, %p3125_p4 }
  0x11   : > { %s2968_s27 = scalar_lea.vmem %s133_s23, 16  ;;  %p2976_p9 = scmp.lt.s32.totalorder %s133_s23, %s133_s23 }
  0x12   : > { %p2906_p13 = pnand %p2905_p11, %p3121_p3  ;;  %p2969_p1 = scmp.ne.s32.totalorder %s133_s23, %s2968_s27 }
  0x13   : > { %p2977_p8 = scmp.lt.s32.totalorder %s2968_s27, %s2968_s27 }
  0x14   : > { %p2970_p2 = pneg %p2906_p13 }
  0x15   : > { %p2978_p6 = por %p2977_p8, %p2976_p9 }
  0x16   : > { %p2971_p5 = pnand %p2970_p2, %p2969_p1 }
  0x18   : > { %p2972_p7 = pneg %p2971_p5 }
  0x1a   : > { %p2979_p10 = pnand %p2978_p6, %p2972_p7 }
  0x1c   : > { %2982 = shalt.err (!%p2979_p10)
}
  0x1d   : > { %s3067_s28 = smov [#allocation3]   ;;  %s31_s29 = sadd.s32 1, %s3061_s13 }
  0x1e   : > { %2908 = dma.vmem_to_smem (!%p2906_p13), %s133_s23, 16, %s3067_s28, [#allocation5]  }
  0x1f   : > { %s1860_s30 = sshll.u32 %s143_s25, 10  ;;  %p33_p4 = scmp.ge.s32.totalorder %s31_s29, 2 }
  0x20   : > { %s1861_s3 = sshll.u32 %s3061_s13, 6  ;;  %s147_s4 = scalar_lea.vmem [#allocation6], %s1860_s30 }
  0x21   : > { %s159_s5 = sshll.u32 %s147_s4, 4  ;;  %s3743_s29 = smov (%p33_p4, %s31_s29), 0  ;;  %s160_s5 = int_to_ptr.vmem [resolvable:$true] %s159_s5 }
  0x22   : > { %s158_s8 = scalar_lea.hbm %s3724_s1, %s1861_s3  ;;  %s63_s9 = ssub.s32 %s3061_s13, %s3743_s29 }
  0x23   : > { %p65_p6 = scmp.eq.s32.totalorder %s63_s9, 0  ;;  %s144_s18 = scalar_lea.sflag [#allocation4], %s143_s25 }
  0x24   : > { %p2985_p8 = pneg %p3156_p0  ;;  %s2996_s21 = scalar_lea.vmem %s160_s5, 16384 }
  0x25   : > { %s3172_s15 = scalar_select %p65_p6, %s3053_s11, %s67_s16  }
  0x26   : > { %p2997_p10 = scmp.ne.s32.totalorder %s160_s5, %s2996_s21  ;;  %s3068_s22 = smov [#allocation6]  }
  0x27   : > { %s3001_s23 = sshll.u32 %s3068_s22, 4  ;;  %s3002_s23 = int_to_ptr.vmem [resolvable:$false] %s3001_s23 }
  0x28   : > { %p2999_p11 = pnand %p2997_p10, %p2985_p8  ;;  %s3003_s27 = scalar_lea.vmem %s3002_s23, 32768 }
  0x29   : > { %p3004_p13 = scmp.lt.s32.totalorder %s160_s5, %s3002_s23  ;;  %p3005_p1 = scmp.lt.s32.totalorder %s3003_s27, %s2996_s21 }
  0x2a   : > { %p3000_p12 = pneg %p2999_p11 }
  0x2b   : > { %p3006_p2 = por %p3005_p1, %p3004_p13 }
  0x2d   : > { %p3007_p5 = pnand %p3006_p2, %p3000_p12 }
  0x2f   : > { %3010 = shalt.err (!%p3007_p5)
}
  0x30   : > { %s3069_s28 = smov 128   ;;  %s3070_s16 = smov 64  }
  0x31   : > { %s3071_s30 = smov 4   ;;  %p3734_p7 = scmp.ne.s32.totalorder %s3732_s24, 0 }
  0x32   : > { %2912 = dma.hbm_to_vmem [thread:$0]  (!%p3156_p0), %s158_s8, 16384, %s160_s5, %s144_s18, %s3069_s28, %s3070_s16, %s3071_s30  }
  0x33   : > { %171 = sbr.rel (%p3734_p7) target bundleno = 270 (0x10e), region = 28 }
  0x38   : > { %3036 = dma.done.wait (%p3121_p3), [#allocation5], 16  }
  0x39   : > { %3038 = vsyncadd (%p3121_p3), [#allocation5], 4294967280  ;;  %s3185_s25 = sand.u32 1, %s3049_s10   ;;  %p3735_p0 = scmp.ne.s32.totalorder %s3730_s19, 0 }
  0x3a   : > { %s1864_s3 = sshll.u32 %s3185_s25, 10  ;;  %s178_s4 = scalar_lea.sflag [#allocation4], %s3185_s25 }
  0x3b   : > { %s3189_s6 = scalar_lea.vmem [#allocation6], %s1864_s3 }
  0x3c   : > { %3040 = dma.done.wait (%p3735_p0), %s178_s4, 16384  }
  0x3d   : > { %3042 = vsyncadd (%p3735_p0), %s178_s4, 4294950912 }
  0x3e   : > { %186 = sfence }
  0x3f   : > { %s3195_s24 = sld [smem:[#allocation3]]  ;;  %v2166_v0 = vld [vmem:[%s3189_s6] sm:$0xff]   ;;  %v2757_v16 = vld [vmem:[%s3189_s6 + $0x8] sm:$0xff]   ;;  %s1865_s18 = sshll.u32 %s3185_s25, 7 }
  0x40   : > { %v2772_v1 = vld [vmem:[%s3189_s6 + $0x80] sm:$0xff]   ;;  %v2167_v3 = vunpack.c.l.bf16 %v2166_v0  ;;  %v2168_v4 = vunpack.c.h.bf16 %v2166_v0  ;;  %s3200_s17 = sld [smem:[#allocation3 + $0x1]]  ;;  %v2773_v21 = vld [vmem:[%s3189_s6 + $0x88] sm:$0xff]   ;;  %v2171_v28 = vunpack.c.l.bf16 %v2757_v16  ;;  %v2172_v29 = vunpack.c.h.bf16 %v2757_v16  ;;  %s3277_s21 = scalar_lea.vmem [#allocation7], %s1865_s18 }
  0x41   : > { %v2788_v2 = vld [vmem:[%s3189_s6 + $0x100] sm:$0xff]   ;;  %v2231_v5 = vunpack.c.l.bf16 %v2772_v1  ;;  %v2232_v6 = vunpack.c.h.bf16 %v2772_v1  ;;  %s3205_s19 = sld [smem:[#allocation3 + $0x2]]  ;;  %v2789_v22 = vld [vmem:[%s3189_s6 + $0x108] sm:$0xff]   ;;  %v2235_v30 = vunpack.c.l.bf16 %v2773_v21  ;;  %v2236_v31 = vunpack.c.h.bf16 %v2773_v21  ;;  %p3736_p3 = scmp.ne.s32.totalorder %s3731_s20, 0 }
  0x42   : > { %v2804_v7 = vld [vmem:[%s3189_s6 + $0x180] sm:$0xff]   ;;  %v2295_v10 = vunpack.c.l.bf16 %v2788_v2  ;;  %v2296_v11 = vunpack.c.h.bf16 %v2788_v2  ;;  %s3210_s26 = sld [smem:[#allocation3 + $0x3]]  ;;  %v3215_v23 = vld [vmem:[%s3189_s6 + $0x188] sm:$0xff]   ;;  %v2299_v33 = vunpack.c.l.bf16 %v2789_v22  ;;  %v2300_v34 = vunpack.c.h.bf16 %v2789_v22  ;;  %s2130_s22 = sshll.u32 (%p3736_p3), %s3057_s12, 2 }
  0x43   : > { %v2820_v8 = vld [vmem:[%s3189_s6 + $0x200] sm:$0xff]   ;;  %v2359_v12 = vunpack.c.l.bf16 %v2804_v7  ;;  %v2360_v13 = vunpack.c.h.bf16 %v2804_v7  ;;  %s1965_s5 = sld [smem:[#allocation3 + $0x4]]  ;;  %v2363_v35 = vunpack.c.l.bf16 %v3215_v23  ;;  %v2364_v16 = vunpack.c.h.bf16 %v3215_v23  ;;  %v2853_v22 = vld [vmem:[%s3189_s6 + $0x308] sm:$0xff]   ;;  %s3641_s28 = scalar_lea.vmem (%p3736_p3), %s3725_s2, %s2130_s22 }
  0x44   : > { %v2836_v9 = vld [vmem:[%s3189_s6 + $0x280] sm:$0xff]   ;;  %v2423_v17 = vunpack.c.l.bf16 %v2820_v8  ;;  %v2424_v18 = vunpack.c.h.bf16 %v2820_v8  ;;  %s3217_s7 = sld [smem:[#allocation3 + $0x5]]  ;;  %v2821_v8 = vld [vmem:[%s3189_s6 + $0x208] sm:$0xff]  }
  0x45   : > { %v2852_v14 = vld [vmem:[%s3189_s6 + $0x300] sm:$0xff]   ;;  %v2487_v19 = vunpack.c.l.bf16 %v2836_v9  ;;  %v2488_v20 = vunpack.c.h.bf16 %v2836_v9  ;;  %v3220_v32 = vstv %s3195_s24  ;;  %s2031_s8 = sld [smem:[#allocation3 + $0x6]]  ;;  %v2837_v9 = vld [vmem:[%s3189_s6 + $0x288] sm:$0xff]  }
  0x46   : > { %v2868_v15 = vld [vmem:[%s3189_s6 + $0x380] sm:$0xff]   ;;  %v2551_v24 = vunpack.c.l.bf16 %v2852_v14  ;;  %v2552_v25 = vunpack.c.h.bf16 %v2852_v14  ;;  %v308_v36 = vmul.f32 %v2167_v3, %v3220_v32  ;;  %v309_v37 = vmul.f32 %v2168_v4, %v3220_v32  ;;  %s2064_s9 = sld [smem:[#allocation3 + $0x7]] }
  0x47   : > { %v2615_v26 = vunpack.c.l.bf16 %v2868_v15  ;;  %v2616_v27 = vunpack.c.h.bf16 %v2868_v15  ;;  %v3226_v38 = vstv %s3200_s17  ;;  %v310_v39 = vmul.f32 %v2171_v28, %v3220_v32 }
  0x48   : > { %v408_v40 = vmul.f32 %v2231_v5, %v3226_v38  ;;  %v409_v41 = vmul.f32 %v2232_v6, %v3226_v38  ;;  %v3232_v42 = vstv %s3205_s19  ;;  %v311_v43 = vmul.f32 %v2172_v29, %v3220_v32 }
  0x49   : > { %v540_v44 = vmul.f32 %v2295_v10, %v3232_v42  ;;  %v541_v45 = vmul.f32 %v2296_v11, %v3232_v42  ;;  %v3238_v46 = vstv %s3210_s26  ;;  %v410_v47 = vmul.f32 %v2235_v30, %v3226_v38 }
  0x4a   : > { %v672_v48 = vmul.f32 %v2359_v12, %v3238_v46  ;;  %v673_v49 = vmul.f32 %v2360_v13, %v3238_v46  ;;  %v3243_v50 = vstv %s1965_s5  ;;  %v411_v51 = vmul.f32 %v2236_v31, %v3226_v38  ;;  %v2869_v31 = vld [vmem:[%s3189_s6 + $0x388] sm:$0xff]  }
  0x4b   : > { %v572_v52 = vadd.f32 %v540_v44, %v308_v36  ;;  %v573_v53 = vadd.f32 %v541_v45, %v309_v37  ;;  %v804_v54 = vmul.f32 %v2423_v17, %v3243_v50  ;;  %v805_v55 = vmul.f32 %v2424_v18, %v3243_v50  ;;  %v2758_v37 = vld [vmem:[%s3189_s6 + $0x10] sm:$0xff]  }
  0x4c   : > { %v704_v56 = vadd.f32 %v672_v48, %v408_v40  ;;  %v705_v57 = vadd.f32 %v673_v49, %v409_v41  ;;  %v3249_v58 = vstv %s3217_s7  ;;  %v3251_v59 = vstv %s2031_s8 }
  0x4d   : > { %v836_v60 = vadd.f32 %v804_v54, %v572_v52  ;;  %v837_v61 = vadd.f32 %v805_v55, %v573_v53  ;;  %v936_v62 = vmul.f32 %v2487_v19, %v3249_v58  ;;  %v937_v63 = vmul.f32 %v2488_v20, %v3249_v58  ;;  %v2790_v55 = vld [vmem:[%s3189_s6 + $0x110] sm:$0xff]  }
  0x4e   : > { %v1068_v0 = vmul.f32 %v2551_v24, %v3251_v59  ;;  %v1069_v1 = vmul.f32 %v2552_v25, %v3251_v59  ;;  %v3257_v2 = vstv %s2064_s9  ;;  %v542_v3 = vmul.f32 %v2299_v33, %v3232_v42 }
  0x4f   : > { %v968_v4 = vadd.f32 %v936_v62, %v704_v56  ;;  %v969_v5 = vadd.f32 %v937_v63, %v705_v57  ;;  %v1200_v6 = vmul.f32 %v2615_v26, %v3257_v2  ;;  %v1201_v7 = vmul.f32 %v2616_v27, %v3257_v2  ;;  %v2806_v62 = vld [vmem:[%s3189_s6 + $0x190] sm:$0xff]  }
  0x50   : > { %v1100_v10 = vadd.f32 %v1068_v0, %v836_v60  ;;  %v1101_v11 = vadd.f32 %v1069_v1, %v837_v61  ;;  %v543_v12 = vmul.f32 %v2300_v34, %v3232_v42  ;;  %v574_v13 = vadd.f32 %v542_v3, %v310_v39  ;;  %v2774_v39 = vld [vmem:[%s3189_s6 + $0x90] sm:$0xff]  }
  0x51   : > { %v1232_v14 = vadd.f32 %v1200_v6, %v968_v4  ;;  %v1233_v15 = vadd.f32 %v1201_v7, %v969_v5  ;;  %v674_v17 = vmul.f32 %v2363_v35, %v3238_v46  ;;  %v2427_v19 = vunpack.c.l.bf16 %v2821_v8  ;;  %v2822_v63 = vld [vmem:[%s3189_s6 + $0x210] sm:$0xff]  }
  0x52   : > { %v575_v18 = vadd.f32 %v543_v12, %v311_v43  ;;  %v2428_v20 = vunpack.c.h.bf16 %v2821_v8  ;;  %v2491_v21 = vunpack.c.l.bf16 %v2837_v9  ;;  %v675_v26 = vmul.f32 %v2364_v16, %v3238_v46 }
  0x53   : > { %v1296_v24 = vadd.f32 %v1232_v14, %v1100_v10  ;;  %v1297_v25 = vadd.f32 %v1233_v15, %v1101_v11  ;;  %v706_v27 = vadd.f32 %v674_v17, %v410_v47  ;;  %v806_v28 = vmul.f32 %v2427_v19, %v3243_v50 }
  0x54   : > { %v807_v29 = vmul.f32 %v2428_v20, %v3243_v50  ;;  %v2492_v30 = vunpack.c.h.bf16 %v2837_v9  ;;  %v938_v23 = vmul.f32 %v2491_v21, %v3249_v58  ;;  %v707_v34 = vadd.f32 %v675_v26, %v411_v51 }
  0x55   : > { %v2680_v33 = vpack.c.bf16 %v1297_v25, %v1296_v24  ;;  %v2555_v35 = vunpack.c.l.bf16 %v2853_v22  ;;  %v2556_v36 = vunpack.c.h.bf16 %v2853_v22  ;;  %v838_v40 = vadd.f32 %v806_v28, %v574_v13  ;;  %v2838_v13 = vld [vmem:[%s3189_s6 + $0x290] sm:$0xff]  }
  0x56   : > { %v839_v41 = vadd.f32 %v807_v29, %v575_v18  ;;  %v939_v43 = vmul.f32 %v2492_v30, %v3249_v58  ;;  %v970_v44 = vadd.f32 %v938_v23, %v706_v27  ;;  %v2619_v48 = vunpack.c.l.bf16 %v2869_v31  ;;  %v2854_v22 = vld [vmem:[%s3189_s6 + $0x310] sm:$0xff]  }
  0x57   : > { %2681 = vst [vmem:[%s3277_s21] sm:$0xff] %v2680_v33   ;;  %v1070_v45 = vmul.f32 %v2555_v35, %v3251_v59  ;;  %v1071_v47 = vmul.f32 %v2556_v36, %v3251_v59  ;;  %v2620_v49 = vunpack.c.h.bf16 %v2869_v31  ;;  %v2175_v52 = vunpack.c.l.bf16 %v2758_v37  ;;  %v2870_v28 = vld [vmem:[%s3189_s6 + $0x390] sm:$0xff]   ;;  %v2759_v33 = vld [vmem:[%s3189_s6 + $0x18] sm:$0xff]  }
  0x58   : > { %v971_v51 = vadd.f32 %v939_v43, %v707_v34  ;;  %v2176_v53 = vunpack.c.h.bf16 %v2758_v37  ;;  %v2239_v54 = vunpack.c.l.bf16 %v2774_v39  ;;  %v1202_v60 = vmul.f32 %v2619_v48, %v3257_v2 }
  0x59   : > { %v1102_v56 = vadd.f32 %v1070_v45, %v838_v40  ;;  %v1103_v57 = vadd.f32 %v1071_v47, %v839_v41  ;;  %v1203_v61 = vmul.f32 %v2620_v49, %v3257_v2  ;;  %v312_v0 = vmul.f32 %v2175_v52, %v3220_v32 }
  0x5a   : > { %v313_v1 = vmul.f32 %v2176_v53, %v3220_v32  ;;  %v2240_v3 = vunpack.c.h.bf16 %v2774_v39  ;;  %v412_v4 = vmul.f32 %v2239_v54, %v3226_v38  ;;  %v1234_v5 = vadd.f32 %v1202_v60, %v970_v44  ;;  %v2775_v44 = vld [vmem:[%s3189_s6 + $0x98] sm:$0xff]  }
  0x5b   : > { %v1235_v6 = vadd.f32 %v1203_v61, %v971_v51  ;;  %v2303_v7 = vunpack.c.l.bf16 %v2790_v55  ;;  %v2304_v8 = vunpack.c.h.bf16 %v2790_v55  ;;  %v2367_v10 = vunpack.c.l.bf16 %v2806_v62  ;;  %v2791_v55 = vld [vmem:[%s3189_s6 + $0x118] sm:$0xff]  }
  0x5c   : > { %v413_v9 = vmul.f32 %v2240_v3, %v3226_v38  ;;  %v2368_v11 = vunpack.c.h.bf16 %v2806_v62  ;;  %v2431_v12 = vunpack.c.l.bf16 %v2822_v63  ;;  %v1298_v14 = vadd.f32 %v1234_v5, %v1102_v56  ;;  %v2807_v56 = vld [vmem:[%s3189_s6 + $0x198] sm:$0xff]  }
  0x5d   : > { %v1299_v15 = vadd.f32 %v1235_v6, %v1103_v57  ;;  %v544_v16 = vmul.f32 %v2303_v7, %v3232_v42  ;;  %v545_v17 = vmul.f32 %v2304_v8, %v3232_v42  ;;  %v676_v18 = vmul.f32 %v2367_v10, %v3238_v46 }
  0x5e   : > { %v677_v19 = vmul.f32 %v2368_v11, %v3238_v46  ;;  %v2432_v20 = vunpack.c.h.bf16 %v2822_v63  ;;  %v808_v21 = vmul.f32 %v2431_v12, %v3243_v50  ;;  %v2495_v27 = vunpack.c.l.bf16 %v2838_v13 }
  0x5f   : > { %v2685_v24 = vpack.c.bf16 %v1299_v15, %v1298_v14  ;;  %v576_v25 = vadd.f32 %v544_v16, %v312_v0  ;;  %v577_v26 = vadd.f32 %v545_v17, %v313_v1  ;;  %v708_v29 = vadd.f32 %v676_v18, %v412_v4  ;;  %v2823_v4 = vld [vmem:[%s3189_s6 + $0x218] sm:$0xff]  }
  0x60   : > { %v709_v30 = vadd.f32 %v677_v19, %v413_v9  ;;  %v809_v23 = vmul.f32 %v2432_v20, %v3243_v50  ;;  %v2496_v31 = vunpack.c.h.bf16 %v2838_v13  ;;  %v940_v35 = vmul.f32 %v2495_v27, %v3249_v58  ;;  %v2839_v9 = vld [vmem:[%s3189_s6 + $0x298] sm:$0xff]  }
  0x61   : > { %2884 = vst [vmem:[%s3277_s21 + $0x8] sm:$0xff] %v2685_v24   ;;  %v840_v34 = vadd.f32 %v808_v21, %v576_v25  ;;  %v2559_v36 = vunpack.c.l.bf16 %v2854_v22  ;;  %v2560_v37 = vunpack.c.h.bf16 %v2854_v22  ;;  %v2623_v41 = vunpack.c.l.bf16 %v2870_v28  ;;  %v2855_v22 = vld [vmem:[%s3189_s6 + $0x318] sm:$0xff]  }
  0x62   : > { %v841_v39 = vadd.f32 %v809_v23, %v577_v26  ;;  %v941_v40 = vmul.f32 %v2496_v31, %v3249_v58  ;;  %v2624_v43 = vunpack.c.h.bf16 %v2870_v28  ;;  %v972_v45 = vadd.f32 %v940_v35, %v708_v29  ;;  %v2871_v24 = vld [vmem:[%s3189_s6 + $0x398] sm:$0xff]  }
  0x63   : > { %v1072_v47 = vmul.f32 %v2559_v36, %v3251_v59  ;;  %v1073_v48 = vmul.f32 %v2560_v37, %v3251_v59  ;;  %v2179_v49 = vunpack.c.l.bf16 %v2759_v33  ;;  %v1204_v52 = vmul.f32 %v2623_v41, %v3257_v2 }
  0x64   : > { %v973_v51 = vadd.f32 %v941_v40, %v709_v30  ;;  %v1205_v53 = vmul.f32 %v2624_v43, %v3257_v2  ;;  %v2180_v54 = vunpack.c.h.bf16 %v2759_v33  ;;  %v2243_v62 = vunpack.c.l.bf16 %v2775_v44  ;;  %v2760_v33 = vld [vmem:[%s3189_s6 + $0x20] sm:$0xff]  }
  0x65   : > { %v1104_v57 = vadd.f32 %v1072_v47, %v840_v34  ;;  %v1105_v60 = vadd.f32 %v1073_v48, %v841_v39  ;;  %v314_v61 = vmul.f32 %v2179_v49, %v3220_v32  ;;  %v1236_v63 = vadd.f32 %v1204_v52, %v972_v45  ;;  %v2776_v39 = vld [vmem:[%s3189_s6 + $0xa0] sm:$0xff]  }
  0x66   : > { %v1237_v0 = vadd.f32 %v1205_v53, %v973_v51  ;;  %v315_v1 = vmul.f32 %v2180_v54, %v3220_v32  ;;  %v2244_v3 = vunpack.c.h.bf16 %v2775_v44  ;;  %v414_v5 = vmul.f32 %v2243_v62, %v3226_v38 }
  0x67   : > { %v2307_v6 = vunpack.c.l.bf16 %v2791_v55  ;;  %v2308_v7 = vunpack.c.h.bf16 %v2791_v55  ;;  %v2371_v8 = vunpack.c.l.bf16 %v2807_v56  ;;  %v1300_v10 = vadd.f32 %v1236_v63, %v1104_v57  ;;  %v2792_v55 = vld [vmem:[%s3189_s6 + $0x120] sm:$0xff]  }
  0x68   : > { %v1301_v11 = vadd.f32 %v1237_v0, %v1105_v60  ;;  %v415_v12 = vmul.f32 %v2244_v3, %v3226_v38  ;;  %v2372_v13 = vunpack.c.h.bf16 %v2807_v56  ;;  %v2435_v17 = vunpack.c.l.bf16 %v2823_v4  ;;  %v2808_v56 = vld [vmem:[%s3189_s6 + $0x1a0] sm:$0xff]  }
  0x69   : > { %v546_v14 = vmul.f32 %v2307_v6, %v3232_v42  ;;  %v547_v15 = vmul.f32 %v2308_v7, %v3232_v42  ;;  %v678_v16 = vmul.f32 %v2371_v8, %v3238_v46  ;;  %v2436_v20 = vunpack.c.h.bf16 %v2823_v4  ;;  %v2824_v63 = vld [vmem:[%s3189_s6 + $0x220] sm:$0xff]  }
  0x6a   : > { %v2690_v18 = vpack.c.bf16 %v1301_v11, %v1300_v10  ;;  %v679_v19 = vmul.f32 %v2372_v13, %v3238_v46  ;;  %v2499_v21 = vunpack.c.l.bf16 %v2839_v9  ;;  %v810_v28 = vmul.f32 %v2435_v17, %v3243_v50 }
  0x6b   : > { %v578_v25 = vadd.f32 %v546_v14, %v314_v61  ;;  %v579_v26 = vadd.f32 %v547_v15, %v315_v1  ;;  %v710_v27 = vadd.f32 %v678_v16, %v414_v5  ;;  %v811_v30 = vmul.f32 %v2436_v20, %v3243_v50 }
  0x6c   : > { %2885 = vst [vmem:[%s3277_s21 + $0x10] sm:$0xff] %v2690_v18   ;;  %v711_v29 = vadd.f32 %v679_v19, %v415_v12  ;;  %v2500_v23 = vunpack.c.h.bf16 %v2839_v9  ;;  %v942_v31 = vmul.f32 %v2499_v21, %v3249_v58  ;;  %v2563_v35 = vunpack.c.l.bf16 %v2855_v22  ;;  %v2840_v9 = vld [vmem:[%s3189_s6 + $0x2a0] sm:$0xff]  }
  0x6d   : > { %v842_v34 = vadd.f32 %v810_v28, %v578_v25  ;;  %v2564_v36 = vunpack.c.h.bf16 %v2855_v22  ;;  %v2627_v37 = vunpack.c.l.bf16 %v2871_v24  ;;  %v843_v40 = vadd.f32 %v811_v30, %v579_v26  ;;  %v2856_v18 = vld [vmem:[%s3189_s6 + $0x320] sm:$0xff]  }
  0x6e   : > { %v943_v41 = vmul.f32 %v2500_v23, %v3249_v58  ;;  %v974_v43 = vadd.f32 %v942_v31, %v710_v27  ;;  %v2628_v44 = vunpack.c.h.bf16 %v2871_v24  ;;  %v1074_v45 = vmul.f32 %v2563_v35, %v3251_v59  ;;  %v2872_v24 = vld [vmem:[%s3189_s6 + $0x3a0] sm:$0xff]  }
  0x6f   : > { %v1075_v47 = vmul.f32 %v2564_v36, %v3251_v59  ;;  %v1206_v48 = vmul.f32 %v2627_v37, %v3257_v2  ;;  %v2183_v49 = vunpack.c.l.bf16 %v2760_v33  ;;  %v2184_v53 = vunpack.c.h.bf16 %v2760_v33  ;;  %v2761_v33 = vld [vmem:[%s3189_s6 + $0x28] sm:$0xff]  }
  0x70   : > { %v975_v51 = vadd.f32 %v943_v41, %v711_v29  ;;  %v1207_v52 = vmul.f32 %v2628_v44, %v3257_v2  ;;  %v2247_v54 = vunpack.c.l.bf16 %v2776_v39  ;;  %v1106_v57 = vadd.f32 %v1074_v45, %v842_v34 }
  0x71   : > { %v1107_v60 = vadd.f32 %v1075_v47, %v843_v40  ;;  %v1238_v61 = vadd.f32 %v1206_v48, %v974_v43  ;;  %v316_v62 = vmul.f32 %v2183_v49, %v3220_v32  ;;  %v317_v1 = vmul.f32 %v2184_v53, %v3220_v32 }
  0x72   : > { %v1239_v0 = vadd.f32 %v1207_v52, %v975_v51  ;;  %v2248_v3 = vunpack.c.h.bf16 %v2776_v39  ;;  %v416_v4 = vmul.f32 %v2247_v54, %v3226_v38  ;;  %v2311_v6 = vunpack.c.l.bf16 %v2792_v55  ;;  %v2777_v39 = vld [vmem:[%s3189_s6 + $0xa8] sm:$0xff]  }
  0x73   : > { %v1302_v5 = vadd.f32 %v1238_v61, %v1106_v57  ;;  %v2312_v7 = vunpack.c.h.bf16 %v2792_v55  ;;  %v2375_v8 = vunpack.c.l.bf16 %v2808_v56  ;;  %v2376_v12 = vunpack.c.h.bf16 %v2808_v56  ;;  %v2793_v51 = vld [vmem:[%s3189_s6 + $0x128] sm:$0xff]  }
  0x74   : > { %v1303_v10 = vadd.f32 %v1239_v0, %v1107_v60  ;;  %v417_v11 = vmul.f32 %v2248_v3, %v3226_v38  ;;  %v2439_v13 = vunpack.c.l.bf16 %v2824_v63  ;;  %v548_v14 = vmul.f32 %v2311_v6, %v3232_v42  ;;  %v2809_v56 = vld [vmem:[%s3189_s6 + $0x1a8] sm:$0xff]  }
  0x75   : > { %v549_v15 = vmul.f32 %v2312_v7, %v3232_v42  ;;  %v680_v16 = vmul.f32 %v2375_v8, %v3238_v46  ;;  %v2440_v17 = vunpack.c.h.bf16 %v2824_v63  ;;  %v681_v20 = vmul.f32 %v2376_v12, %v3238_v46  ;;  %v2825_v63 = vld [vmem:[%s3189_s6 + $0x228] sm:$0xff]  }
  0x76   : > { %v2695_v19 = vpack.c.bf16 %v1303_v10, %v1302_v5  ;;  %v812_v21 = vmul.f32 %v2439_v13, %v3243_v50  ;;  %v2503_v22 = vunpack.c.l.bf16 %v2840_v9  ;;  %v580_v25 = vadd.f32 %v548_v14, %v316_v62 }
  0x77   : > { %v581_v26 = vadd.f32 %v549_v15, %v317_v1  ;;  %v712_v27 = vadd.f32 %v680_v16, %v416_v4  ;;  %v813_v28 = vmul.f32 %v2440_v17, %v3243_v50  ;;  %v713_v29 = vadd.f32 %v681_v20, %v417_v11 }
  0x78   : > { %2886 = vst [vmem:[%s3277_s21 + $0x18] sm:$0xff] %v2695_v19   ;;  %v2504_v30 = vunpack.c.h.bf16 %v2840_v9  ;;  %v944_v23 = vmul.f32 %v2503_v22, %v3249_v58  ;;  %v2567_v31 = vunpack.c.l.bf16 %v2856_v18  ;;  %v844_v34 = vadd.f32 %v812_v21, %v580_v25  ;;  %v2841_v9 = vld [vmem:[%s3189_s6 + $0x2a8] sm:$0xff]  }
  0x79   : > { %v845_v35 = vadd.f32 %v813_v28, %v581_v26  ;;  %v2568_v36 = vunpack.c.h.bf16 %v2856_v18  ;;  %v2631_v37 = vunpack.c.l.bf16 %v2872_v24  ;;  %v2632_v44 = vunpack.c.h.bf16 %v2872_v24  ;;  %v2857_v18 = vld [vmem:[%s3189_s6 + $0x328] sm:$0xff]  }
  0x7a   : > { %v945_v40 = vmul.f32 %v2504_v30, %v3249_v58  ;;  %v976_v41 = vadd.f32 %v944_v23, %v712_v27  ;;  %v1076_v43 = vmul.f32 %v2567_v31, %v3251_v59  ;;  %v2187_v48 = vunpack.c.l.bf16 %v2761_v33  ;;  %v2873_v24 = vld [vmem:[%s3189_s6 + $0x3a8] sm:$0xff]  }
  0x7b   : > { %v1077_v45 = vmul.f32 %v2568_v36, %v3251_v59  ;;  %v1208_v47 = vmul.f32 %v2631_v37, %v3257_v2  ;;  %v2188_v49 = vunpack.c.h.bf16 %v2761_v33  ;;  %v1209_v54 = vmul.f32 %v2632_v44, %v3257_v2 }
  0x7c   : > { %v977_v52 = vadd.f32 %v945_v40, %v713_v29  ;;  %v1108_v53 = vadd.f32 %v1076_v43, %v844_v34  ;;  %v2251_v55 = vunpack.c.l.bf16 %v2777_v39  ;;  %v318_v61 = vmul.f32 %v2187_v48, %v3220_v32  ;;  %v2762_v29 = vld [vmem:[%s3189_s6 + $0x30] sm:$0xff]  }
  0x7d   : > { %v1109_v57 = vadd.f32 %v1077_v45, %v845_v35  ;;  %v1240_v60 = vadd.f32 %v1208_v47, %v976_v41  ;;  %v319_v62 = vmul.f32 %v2188_v49, %v3220_v32  ;;  %v2252_v1 = vunpack.c.h.bf16 %v2777_v39  ;;  %v2778_v39 = vld [vmem:[%s3189_s6 + $0xb0] sm:$0xff]  }
  0x7e   : > { %v1241_v0 = vadd.f32 %v1209_v54, %v977_v52  ;;  %v418_v3 = vmul.f32 %v2251_v55, %v3226_v38  ;;  %v2315_v4 = vunpack.c.l.bf16 %v2793_v51  ;;  %v2316_v6 = vunpack.c.h.bf16 %v2793_v51  ;;  %v2794_v51 = vld [vmem:[%s3189_s6 + $0x130] sm:$0xff]  }
  0x7f   : > { %v1304_v5 = vadd.f32 %v1240_v60, %v1108_v53  ;;  %v2379_v7 = vunpack.c.l.bf16 %v2809_v56  ;;  %v2380_v8 = vunpack.c.h.bf16 %v2809_v56  ;;  %v419_v11 = vmul.f32 %v2252_v1, %v3226_v38  ;;  %v2810_v56 = vld [vmem:[%s3189_s6 + $0x1b0] sm:$0xff]  }
  0x80   : > { %v1305_v10 = vadd.f32 %v1241_v0, %v1109_v57  ;;  %v550_v12 = vmul.f32 %v2315_v4, %v3232_v42  ;;  %v2443_v13 = vunpack.c.l.bf16 %v2825_v63  ;;  %v551_v14 = vmul.f32 %v2316_v6, %v3232_v42 }
  0x81   : > { %v682_v15 = vmul.f32 %v2379_v7, %v3238_v46  ;;  %v683_v16 = vmul.f32 %v2380_v8, %v3238_v46  ;;  %v2444_v17 = vunpack.c.h.bf16 %v2825_v63  ;;  %v2507_v22 = vunpack.c.l.bf16 %v2841_v9  ;;  %v2826_v63 = vld [vmem:[%s3189_s6 + $0x230] sm:$0xff]  }
  0x82   : > { %v2700_v19 = vpack.c.bf16 %v1305_v10, %v1304_v5  ;;  %v582_v20 = vadd.f32 %v550_v12, %v318_v61  ;;  %v814_v21 = vmul.f32 %v2443_v13, %v3243_v50  ;;  %v583_v25 = vadd.f32 %v551_v14, %v319_v62  ;;  %v2842_v5 = vld [vmem:[%s3189_s6 + $0x2b0] sm:$0xff]  }
  0x83   : > { %v714_v26 = vadd.f32 %v682_v15, %v418_v3  ;;  %v715_v27 = vadd.f32 %v683_v16, %v419_v11  ;;  %v815_v28 = vmul.f32 %v2444_v17, %v3243_v50  ;;  %v2508_v23 = vunpack.c.h.bf16 %v2841_v9 }
  0x84   : > { %2887 = vst [vmem:[%s3277_s21 + $0x20] sm:$0xff] %v2700_v19   ;;  %v846_v30 = vadd.f32 %v814_v21, %v582_v20  ;;  %v946_v31 = vmul.f32 %v2507_v22, %v3249_v58  ;;  %v2571_v33 = vunpack.c.l.bf16 %v2857_v18  ;;  %v2572_v35 = vunpack.c.h.bf16 %v2857_v18  ;;  %v2858_v18 = vld [vmem:[%s3189_s6 + $0x330] sm:$0xff]  }
  0x85   : > { %v847_v34 = vadd.f32 %v815_v28, %v583_v25  ;;  %v2635_v36 = vunpack.c.l.bf16 %v2873_v24  ;;  %v2636_v37 = vunpack.c.h.bf16 %v2873_v24  ;;  %v947_v40 = vmul.f32 %v2508_v23, %v3249_v58  ;;  %v2874_v24 = vld [vmem:[%s3189_s6 + $0x3b0] sm:$0xff]  }
  0x86   : > { %v978_v41 = vadd.f32 %v946_v31, %v714_v26  ;;  %v1078_v43 = vmul.f32 %v2571_v33, %v3251_v59  ;;  %v2191_v44 = vunpack.c.l.bf16 %v2762_v29  ;;  %v1079_v45 = vmul.f32 %v2572_v35, %v3251_v59 }
  0x87   : > { %v1210_v47 = vmul.f32 %v2635_v36, %v3257_v2  ;;  %v1211_v48 = vmul.f32 %v2636_v37, %v3257_v2  ;;  %v2192_v49 = vunpack.c.h.bf16 %v2762_v29  ;;  %v979_v52 = vadd.f32 %v947_v40, %v715_v27  ;;  %v2763_v29 = vld [vmem:[%s3189_s6 + $0x38] sm:$0xff]  }
  0x88   : > { %v1110_v53 = vadd.f32 %v1078_v43, %v846_v30  ;;  %v320_v54 = vmul.f32 %v2191_v44, %v3220_v32  ;;  %v2255_v55 = vunpack.c.l.bf16 %v2778_v39  ;;  %v1111_v57 = vadd.f32 %v1079_v45, %v847_v34 }
  0x89   : > { %v1242_v60 = vadd.f32 %v1210_v47, %v978_v41  ;;  %v321_v61 = vmul.f32 %v2192_v49, %v3220_v32  ;;  %v2256_v62 = vunpack.c.h.bf16 %v2778_v39  ;;  %v1243_v0 = vadd.f32 %v1211_v48, %v979_v52  ;;  %v2779_v39 = vld [vmem:[%s3189_s6 + $0xb8] sm:$0xff]  }
  0x8a   : > { %v420_v1 = vmul.f32 %v2255_v55, %v3226_v38  ;;  %v2319_v3 = vunpack.c.l.bf16 %v2794_v51  ;;  %v2320_v4 = vunpack.c.h.bf16 %v2794_v51  ;;  %v2383_v8 = vunpack.c.l.bf16 %v2810_v56  ;;  %v2795_v51 = vld [vmem:[%s3189_s6 + $0x138] sm:$0xff]  }
  0x8b   : > { %v1306_v6 = vadd.f32 %v1242_v60, %v1110_v53  ;;  %v421_v7 = vmul.f32 %v2256_v62, %v3226_v38  ;;  %v2384_v9 = vunpack.c.h.bf16 %v2810_v56  ;;  %v1307_v10 = vadd.f32 %v1243_v0, %v1111_v57  ;;  %v2811_v52 = vld [vmem:[%s3189_s6 + $0x1b8] sm:$0xff]  }
  0x8c   : > { %v552_v11 = vmul.f32 %v2319_v3, %v3232_v42  ;;  %v553_v12 = vmul.f32 %v2320_v4, %v3232_v42  ;;  %v2447_v13 = vunpack.c.l.bf16 %v2826_v63  ;;  %v684_v14 = vmul.f32 %v2383_v8, %v3238_v46 }
  0x8d   : > { %v685_v15 = vmul.f32 %v2384_v9, %v3238_v46  ;;  %v2448_v16 = vunpack.c.h.bf16 %v2826_v63  ;;  %v2511_v17 = vunpack.c.l.bf16 %v2842_v5  ;;  %v2705_v19 = vpack.c.bf16 %v1307_v10, %v1306_v6  ;;  %v2827_v63 = vld [vmem:[%s3189_s6 + $0x238] sm:$0xff]  }
  0x8e   : > { %v584_v20 = vadd.f32 %v552_v11, %v320_v54  ;;  %v585_v21 = vadd.f32 %v553_v12, %v321_v61  ;;  %v816_v22 = vmul.f32 %v2447_v13, %v3243_v50  ;;  %v716_v25 = vadd.f32 %v684_v14, %v420_v1 }
  0x8f   : > { %v717_v26 = vadd.f32 %v685_v15, %v421_v7  ;;  %v817_v27 = vmul.f32 %v2448_v16, %v3243_v50  ;;  %v2512_v28 = vunpack.c.h.bf16 %v2842_v5  ;;  %2888 = vst [vmem:[%s3277_s21 + $0x28] sm:$0xff] %v2705_v19   ;;  %v948_v23 = vmul.f32 %v2511_v17, %v3249_v58  ;;  %v2843_v5 = vld [vmem:[%s3189_s6 + $0x2b8] sm:$0xff]  }
  0x90   : > { %v848_v30 = vadd.f32 %v816_v22, %v584_v20  ;;  %v2575_v31 = vunpack.c.l.bf16 %v2858_v18  ;;  %v2576_v33 = vunpack.c.h.bf16 %v2858_v18  ;;  %v2639_v36 = vunpack.c.l.bf16 %v2874_v24  ;;  %v2859_v18 = vld [vmem:[%s3189_s6 + $0x338] sm:$0xff]  }
  0x91   : > { %v849_v34 = vadd.f32 %v817_v27, %v585_v21  ;;  %v949_v35 = vmul.f32 %v2512_v28, %v3249_v58  ;;  %v2640_v37 = vunpack.c.h.bf16 %v2874_v24  ;;  %v980_v40 = vadd.f32 %v948_v23, %v716_v25  ;;  %v2875_v19 = vld [vmem:[%s3189_s6 + $0x3b8] sm:$0xff]  }
  0x92   : > { %v1080_v41 = vmul.f32 %v2575_v31, %v3251_v59  ;;  %v1081_v43 = vmul.f32 %v2576_v33, %v3251_v59  ;;  %v2195_v44 = vunpack.c.l.bf16 %v2763_v29  ;;  %v1212_v47 = vmul.f32 %v2639_v36, %v3257_v2 }
  0x93   : > { %v981_v45 = vadd.f32 %v949_v35, %v717_v26  ;;  %v1213_v48 = vmul.f32 %v2640_v37, %v3257_v2  ;;  %v2196_v49 = vunpack.c.h.bf16 %v2763_v29  ;;  %v2259_v56 = vunpack.c.l.bf16 %v2779_v39  ;;  %v2764_v29 = vld [vmem:[%s3189_s6 + $0x40] sm:$0xff]  }
  0x94   : > { %v1112_v53 = vadd.f32 %v1080_v41, %v848_v30  ;;  %v1113_v54 = vadd.f32 %v1081_v43, %v849_v34  ;;  %v322_v55 = vmul.f32 %v2195_v44, %v3220_v32  ;;  %v1244_v57 = vadd.f32 %v1212_v47, %v980_v40  ;;  %v2780_v34 = vld [vmem:[%s3189_s6 + $0xc0] sm:$0xff]  }
  0x95   : > { %v1245_v60 = vadd.f32 %v1213_v48, %v981_v45  ;;  %v323_v61 = vmul.f32 %v2196_v49, %v3220_v32  ;;  %v2260_v62 = vunpack.c.h.bf16 %v2779_v39  ;;  %v422_v0 = vmul.f32 %v2259_v56, %v3226_v38 }
  0x96   : > { %v2323_v1 = vunpack.c.l.bf16 %v2795_v51  ;;  %v2324_v3 = vunpack.c.h.bf16 %v2795_v51  ;;  %v2387_v4 = vunpack.c.l.bf16 %v2811_v52  ;;  %v1308_v6 = vadd.f32 %v1244_v57, %v1112_v53  ;;  %v2796_v51 = vld [vmem:[%s3189_s6 + $0x140] sm:$0xff]  }
  0x97   : > { %v1309_v7 = vadd.f32 %v1245_v60, %v1113_v54  ;;  %v423_v8 = vmul.f32 %v2260_v62, %v3226_v38  ;;  %v2388_v9 = vunpack.c.h.bf16 %v2811_v52  ;;  %v2451_v13 = vunpack.c.l.bf16 %v2827_v63  ;;  %v2812_v52 = vld [vmem:[%s3189_s6 + $0x1c0] sm:$0xff]  }
  0x98   : > { %v554_v10 = vmul.f32 %v2323_v1, %v3232_v42  ;;  %v555_v11 = vmul.f32 %v2324_v3, %v3232_v42  ;;  %v686_v12 = vmul.f32 %v2387_v4, %v3238_v46  ;;  %v2452_v16 = vunpack.c.h.bf16 %v2827_v63  ;;  %v2828_v57 = vld [vmem:[%s3189_s6 + $0x240] sm:$0xff]  }
  0x99   : > { %v2710_v14 = vpack.c.bf16 %v1309_v7, %v1308_v6  ;;  %v687_v15 = vmul.f32 %v2388_v9, %v3238_v46  ;;  %v2515_v17 = vunpack.c.l.bf16 %v2843_v5  ;;  %v818_v24 = vmul.f32 %v2451_v13, %v3243_v50 }
  0x9a   : > { %v586_v20 = vadd.f32 %v554_v10, %v322_v55  ;;  %v587_v21 = vadd.f32 %v555_v11, %v323_v61  ;;  %v718_v22 = vadd.f32 %v686_v12, %v422_v0  ;;  %v819_v26 = vmul.f32 %v2452_v16, %v3243_v50 }
  0x9b   : > { %2889 = vst [vmem:[%s3277_s21 + $0x30] sm:$0xff] %v2710_v14   ;;  %v719_v25 = vadd.f32 %v687_v15, %v423_v8  ;;  %v2516_v27 = vunpack.c.h.bf16 %v2843_v5  ;;  %v950_v28 = vmul.f32 %v2515_v17, %v3249_v58  ;;  %v2579_v23 = vunpack.c.l.bf16 %v2859_v18  ;;  %v2844_v5 = vld [vmem:[%s3189_s6 + $0x2c0] sm:$0xff]  }
  0x9c   : > { %v850_v30 = vadd.f32 %v818_v24, %v586_v20  ;;  %v2580_v31 = vunpack.c.h.bf16 %v2859_v18  ;;  %v2643_v33 = vunpack.c.l.bf16 %v2875_v19  ;;  %v851_v35 = vadd.f32 %v819_v26, %v587_v21  ;;  %v2860_v14 = vld [vmem:[%s3189_s6 + $0x340] sm:$0xff]  }
  0x9d   : > { %v951_v36 = vmul.f32 %v2516_v27, %v3249_v58  ;;  %v982_v37 = vadd.f32 %v950_v28, %v718_v22  ;;  %v2644_v39 = vunpack.c.h.bf16 %v2875_v19  ;;  %v1082_v40 = vmul.f32 %v2579_v23, %v3251_v59  ;;  %v2876_v19 = vld [vmem:[%s3189_s6 + $0x3c0] sm:$0xff]  }
  0x9e   : > { %v1083_v41 = vmul.f32 %v2580_v31, %v3251_v59  ;;  %v1214_v43 = vmul.f32 %v2643_v33, %v3257_v2  ;;  %v2199_v44 = vunpack.c.l.bf16 %v2764_v29  ;;  %v2200_v48 = vunpack.c.h.bf16 %v2764_v29  ;;  %v2765_v29 = vld [vmem:[%s3189_s6 + $0x48] sm:$0xff]  }
  0x9f   : > { %v983_v45 = vadd.f32 %v951_v36, %v719_v25  ;;  %v1215_v47 = vmul.f32 %v2644_v39, %v3257_v2  ;;  %v2263_v49 = vunpack.c.l.bf16 %v2780_v34  ;;  %v1114_v53 = vadd.f32 %v1082_v40, %v850_v30 }
  0xa0   : > { %v1115_v54 = vadd.f32 %v1083_v41, %v851_v35  ;;  %v1246_v55 = vadd.f32 %v1214_v43, %v982_v37  ;;  %v324_v56 = vmul.f32 %v2199_v44, %v3220_v32  ;;  %v325_v61 = vmul.f32 %v2200_v48, %v3220_v32 }
  0xa1   : > { %v1247_v60 = vadd.f32 %v1215_v47, %v983_v45  ;;  %v2264_v62 = vunpack.c.h.bf16 %v2780_v34  ;;  %v424_v63 = vmul.f32 %v2263_v49, %v3226_v38  ;;  %v2327_v1 = vunpack.c.l.bf16 %v2796_v51  ;;  %v2781_v34 = vld [vmem:[%s3189_s6 + $0xc8] sm:$0xff]  }
  0xa2   : > { %v1310_v0 = vadd.f32 %v1246_v55, %v1114_v53  ;;  %v2328_v3 = vunpack.c.h.bf16 %v2796_v51  ;;  %v2391_v4 = vunpack.c.l.bf16 %v2812_v52  ;;  %v2392_v8 = vunpack.c.h.bf16 %v2812_v52  ;;  %v2797_v45 = vld [vmem:[%s3189_s6 + $0x148] sm:$0xff]  }
  0xa3   : > { %v1311_v6 = vadd.f32 %v1247_v60, %v1115_v54  ;;  %v425_v7 = vmul.f32 %v2264_v62, %v3226_v38  ;;  %v2455_v9 = vunpack.c.l.bf16 %v2828_v57  ;;  %v556_v10 = vmul.f32 %v2327_v1, %v3232_v42  ;;  %v2813_v52 = vld [vmem:[%s3189_s6 + $0x1c8] sm:$0xff]  }
  0xa4   : > { %v557_v11 = vmul.f32 %v2328_v3, %v3232_v42  ;;  %v688_v12 = vmul.f32 %v2391_v4, %v3238_v46  ;;  %v2456_v13 = vunpack.c.h.bf16 %v2828_v57  ;;  %v689_v16 = vmul.f32 %v2392_v8, %v3238_v46  ;;  %v2829_v57 = vld [vmem:[%s3189_s6 + $0x248] sm:$0xff]  }
  0xa5   : > { %v2715_v15 = vpack.c.bf16 %v1311_v6, %v1310_v0  ;;  %v820_v17 = vmul.f32 %v2455_v9, %v3243_v50  ;;  %v2519_v18 = vunpack.c.l.bf16 %v2844_v5  ;;  %v588_v20 = vadd.f32 %v556_v10, %v324_v56 }
  0xa6   : > { %v589_v21 = vadd.f32 %v557_v11, %v325_v61  ;;  %v720_v22 = vadd.f32 %v688_v12, %v424_v63  ;;  %v821_v24 = vmul.f32 %v2456_v13, %v3243_v50  ;;  %v721_v25 = vadd.f32 %v689_v16, %v425_v7 }
  0xa7   : > { %2890 = vst [vmem:[%s3277_s21 + $0x38] sm:$0xff] %v2715_v15   ;;  %v2520_v26 = vunpack.c.h.bf16 %v2844_v5  ;;  %v952_v27 = vmul.f32 %v2519_v18, %v3249_v58  ;;  %v2583_v28 = vunpack.c.l.bf16 %v2860_v14  ;;  %v852_v30 = vadd.f32 %v820_v17, %v588_v20  ;;  %v2845_v5 = vld [vmem:[%s3189_s6 + $0x2c8] sm:$0xff]  }
  0xa8   : > { %v853_v23 = vadd.f32 %v821_v24, %v589_v21  ;;  %v2584_v31 = vunpack.c.h.bf16 %v2860_v14  ;;  %v2647_v33 = vunpack.c.l.bf16 %v2876_v19  ;;  %v2648_v39 = vunpack.c.h.bf16 %v2876_v19  ;;  %v2861_v14 = vld [vmem:[%s3189_s6 + $0x348] sm:$0xff]  }
  0xa9   : > { %v953_v35 = vmul.f32 %v2520_v26, %v3249_v58  ;;  %v984_v36 = vadd.f32 %v952_v27, %v720_v22  ;;  %v1084_v37 = vmul.f32 %v2583_v28, %v3251_v59  ;;  %v2203_v43 = vunpack.c.l.bf16 %v2765_v29  ;;  %v2877_v19 = vld [vmem:[%s3189_s6 + $0x3c8] sm:$0xff]  }
  0xaa   : > { %v1085_v40 = vmul.f32 %v2584_v31, %v3251_v59  ;;  %v1216_v41 = vmul.f32 %v2647_v33, %v3257_v2  ;;  %v2204_v44 = vunpack.c.h.bf16 %v2765_v29  ;;  %v1217_v49 = vmul.f32 %v2648_v39, %v3257_v2 }
  0xab   : > { %v985_v47 = vadd.f32 %v953_v35, %v721_v25  ;;  %v1116_v48 = vadd.f32 %v1084_v37, %v852_v30  ;;  %v2267_v51 = vunpack.c.l.bf16 %v2781_v34  ;;  %v326_v55 = vmul.f32 %v2203_v43, %v3220_v32  ;;  %v2766_v25 = vld [vmem:[%s3189_s6 + $0x50] sm:$0xff]  }
  0xac   : > { %v1117_v53 = vadd.f32 %v1085_v40, %v853_v23  ;;  %v1248_v54 = vadd.f32 %v1216_v41, %v984_v36  ;;  %v327_v56 = vmul.f32 %v2204_v44, %v3220_v32  ;;  %v2268_v61 = vunpack.c.h.bf16 %v2781_v34  ;;  %v2782_v34 = vld [vmem:[%s3189_s6 + $0xd0] sm:$0xff]  }
  0xad   : > { %v1249_v60 = vadd.f32 %v1217_v49, %v985_v47  ;;  %v426_v62 = vmul.f32 %v2267_v51, %v3226_v38  ;;  %v2331_v63 = vunpack.c.l.bf16 %v2797_v45  ;;  %v2332_v1 = vunpack.c.h.bf16 %v2797_v45  ;;  %v2798_v45 = vld [vmem:[%s3189_s6 + $0x150] sm:$0xff]  }
  0xae   : > { %v1312_v0 = vadd.f32 %v1248_v54, %v1116_v48  ;;  %v2395_v3 = vunpack.c.l.bf16 %v2813_v52  ;;  %v2396_v4 = vunpack.c.h.bf16 %v2813_v52  ;;  %v427_v7 = vmul.f32 %v2268_v61, %v3226_v38  ;;  %v2814_v52 = vld [vmem:[%s3189_s6 + $0x1d0] sm:$0xff]  }
  0xaf   : > { %v1313_v6 = vadd.f32 %v1249_v60, %v1117_v53  ;;  %v558_v8 = vmul.f32 %v2331_v63, %v3232_v42  ;;  %v2459_v9 = vunpack.c.l.bf16 %v2829_v57  ;;  %v559_v10 = vmul.f32 %v2332_v1, %v3232_v42 }
  0xb0   : > { %v690_v11 = vmul.f32 %v2395_v3, %v3238_v46  ;;  %v691_v12 = vmul.f32 %v2396_v4, %v3238_v46  ;;  %v2460_v13 = vunpack.c.h.bf16 %v2829_v57  ;;  %v2523_v18 = vunpack.c.l.bf16 %v2845_v5  ;;  %v2830_v57 = vld [vmem:[%s3189_s6 + $0x250] sm:$0xff]  }
  0xb1   : > { %v2720_v15 = vpack.c.bf16 %v1313_v6, %v1312_v0  ;;  %v590_v16 = vadd.f32 %v558_v8, %v326_v55  ;;  %v822_v17 = vmul.f32 %v2459_v9, %v3243_v50  ;;  %v591_v20 = vadd.f32 %v559_v10, %v327_v56  ;;  %v2846_v0 = vld [vmem:[%s3189_s6 + $0x2d0] sm:$0xff]  }
  0xb2   : > { %v722_v21 = vadd.f32 %v690_v11, %v426_v62  ;;  %v723_v22 = vadd.f32 %v691_v12, %v427_v7  ;;  %v823_v24 = vmul.f32 %v2460_v13, %v3243_v50  ;;  %v2524_v27 = vunpack.c.h.bf16 %v2845_v5 }
  0xb3   : > { %2891 = vst [vmem:[%s3277_s21 + $0x40] sm:$0xff] %v2720_v15   ;;  %v854_v26 = vadd.f32 %v822_v17, %v590_v16  ;;  %v954_v28 = vmul.f32 %v2523_v18, %v3249_v58  ;;  %v2587_v29 = vunpack.c.l.bf16 %v2861_v14  ;;  %v2588_v23 = vunpack.c.h.bf16 %v2861_v14  ;;  %v2862_v14 = vld [vmem:[%s3189_s6 + $0x350] sm:$0xff]  }
  0xb4   : > { %v855_v30 = vadd.f32 %v823_v24, %v591_v20  ;;  %v2651_v31 = vunpack.c.l.bf16 %v2877_v19  ;;  %v2652_v33 = vunpack.c.h.bf16 %v2877_v19  ;;  %v955_v35 = vmul.f32 %v2524_v27, %v3249_v58  ;;  %v2878_v19 = vld [vmem:[%s3189_s6 + $0x3d0] sm:$0xff]  }
  0xb5   : > { %v986_v36 = vadd.f32 %v954_v28, %v722_v21  ;;  %v1086_v37 = vmul.f32 %v2587_v29, %v3251_v59  ;;  %v2207_v39 = vunpack.c.l.bf16 %v2766_v25  ;;  %v1087_v40 = vmul.f32 %v2588_v23, %v3251_v59 }
  0xb6   : > { %v1218_v41 = vmul.f32 %v2651_v31, %v3257_v2  ;;  %v1219_v43 = vmul.f32 %v2652_v33, %v3257_v2  ;;  %v2208_v44 = vunpack.c.h.bf16 %v2766_v25  ;;  %v987_v47 = vadd.f32 %v955_v35, %v723_v22  ;;  %v2767_v25 = vld [vmem:[%s3189_s6 + $0x58] sm:$0xff]  }
  0xb7   : > { %v1118_v48 = vadd.f32 %v1086_v37, %v854_v26  ;;  %v328_v49 = vmul.f32 %v2207_v39, %v3220_v32  ;;  %v2271_v51 = vunpack.c.l.bf16 %v2782_v34  ;;  %v1119_v53 = vadd.f32 %v1087_v40, %v855_v30 }
  0xb8   : > { %v1250_v54 = vadd.f32 %v1218_v41, %v986_v36  ;;  %v329_v55 = vmul.f32 %v2208_v44, %v3220_v32  ;;  %v2272_v56 = vunpack.c.h.bf16 %v2782_v34  ;;  %v1251_v60 = vadd.f32 %v1219_v43, %v987_v47  ;;  %v2783_v34 = vld [vmem:[%s3189_s6 + $0xd8] sm:$0xff]  }
  0xb9   : > { %v428_v61 = vmul.f32 %v2271_v51, %v3226_v38  ;;  %v2335_v62 = vunpack.c.l.bf16 %v2798_v45  ;;  %v2336_v63 = vunpack.c.h.bf16 %v2798_v45  ;;  %v2399_v4 = vunpack.c.l.bf16 %v2814_v52  ;;  %v2799_v45 = vld [vmem:[%s3189_s6 + $0x158] sm:$0xff]  }
  0xba   : > { %v1314_v1 = vadd.f32 %v1250_v54, %v1118_v48  ;;  %v429_v3 = vmul.f32 %v2272_v56, %v3226_v38  ;;  %v2400_v5 = vunpack.c.h.bf16 %v2814_v52  ;;  %v1315_v6 = vadd.f32 %v1251_v60, %v1119_v53  ;;  %v2815_v47 = vld [vmem:[%s3189_s6 + $0x1d8] sm:$0xff]  }
  0xbb   : > { %v560_v7 = vmul.f32 %v2335_v62, %v3232_v42  ;;  %v561_v8 = vmul.f32 %v2336_v63, %v3232_v42  ;;  %v2463_v9 = vunpack.c.l.bf16 %v2830_v57  ;;  %v692_v10 = vmul.f32 %v2399_v4, %v3238_v46 }
  0xbc   : > { %v693_v11 = vmul.f32 %v2400_v5, %v3238_v46  ;;  %v2464_v12 = vunpack.c.h.bf16 %v2830_v57  ;;  %v2527_v13 = vunpack.c.l.bf16 %v2846_v0  ;;  %v2725_v15 = vpack.c.bf16 %v1315_v6, %v1314_v1  ;;  %v2831_v57 = vld [vmem:[%s3189_s6 + $0x258] sm:$0xff]  }
  0xbd   : > { %v592_v16 = vadd.f32 %v560_v7, %v328_v49  ;;  %v593_v17 = vadd.f32 %v561_v8, %v329_v55  ;;  %v824_v18 = vmul.f32 %v2463_v9, %v3243_v50  ;;  %v724_v20 = vadd.f32 %v692_v10, %v428_v61 }
  0xbe   : > { %v725_v21 = vadd.f32 %v693_v11, %v429_v3  ;;  %v825_v22 = vmul.f32 %v2464_v12, %v3243_v50  ;;  %v2528_v24 = vunpack.c.h.bf16 %v2846_v0  ;;  %2892 = vst [vmem:[%s3277_s21 + $0x48] sm:$0xff] %v2725_v15   ;;  %v956_v27 = vmul.f32 %v2527_v13, %v3249_v58  ;;  %v2847_v0 = vld [vmem:[%s3189_s6 + $0x2d8] sm:$0xff]  }
  0xbf   : > { %v856_v26 = vadd.f32 %v824_v18, %v592_v16  ;;  %v2591_v28 = vunpack.c.l.bf16 %v2862_v14  ;;  %v2592_v29 = vunpack.c.h.bf16 %v2862_v14  ;;  %v2655_v31 = vunpack.c.l.bf16 %v2878_v19  ;;  %v2863_v14 = vld [vmem:[%s3189_s6 + $0x358] sm:$0xff]  }
  0xc0   : > { %v857_v30 = vadd.f32 %v825_v22, %v593_v17  ;;  %v957_v23 = vmul.f32 %v2528_v24, %v3249_v58  ;;  %v2656_v33 = vunpack.c.h.bf16 %v2878_v19  ;;  %v988_v35 = vadd.f32 %v956_v27, %v724_v20  ;;  %v2879_v15 = vld [vmem:[%s3189_s6 + $0x3d8] sm:$0xff]  }
  0xc1   : > { %v1088_v36 = vmul.f32 %v2591_v28, %v3251_v59  ;;  %v1089_v37 = vmul.f32 %v2592_v29, %v3251_v59  ;;  %v2211_v39 = vunpack.c.l.bf16 %v2767_v25  ;;  %v1220_v41 = vmul.f32 %v2655_v31, %v3257_v2 }
  0xc2   : > { %v989_v40 = vadd.f32 %v957_v23, %v725_v21  ;;  %v1221_v43 = vmul.f32 %v2656_v33, %v3257_v2  ;;  %v2212_v44 = vunpack.c.h.bf16 %v2767_v25  ;;  %v2275_v52 = vunpack.c.l.bf16 %v2783_v34  ;;  %v2768_v25 = vld [vmem:[%s3189_s6 + $0x60] sm:$0xff]  }
  0xc3   : > { %v1120_v48 = vadd.f32 %v1088_v36, %v856_v26  ;;  %v1121_v49 = vadd.f32 %v1089_v37, %v857_v30  ;;  %v330_v51 = vmul.f32 %v2211_v39, %v3220_v32  ;;  %v1252_v53 = vadd.f32 %v1220_v41, %v988_v35  ;;  %v2784_v30 = vld [vmem:[%s3189_s6 + $0xe0] sm:$0xff]  }
  0xc4   : > { %v1253_v54 = vadd.f32 %v1221_v43, %v989_v40  ;;  %v331_v55 = vmul.f32 %v2212_v44, %v3220_v32  ;;  %v2276_v56 = vunpack.c.h.bf16 %v2783_v34  ;;  %v430_v60 = vmul.f32 %v2275_v52, %v3226_v38 }
  0xc5   : > { %v2339_v61 = vunpack.c.l.bf16 %v2799_v45  ;;  %v2340_v62 = vunpack.c.h.bf16 %v2799_v45  ;;  %v2403_v63 = vunpack.c.l.bf16 %v2815_v47  ;;  %v1316_v1 = vadd.f32 %v1252_v53, %v1120_v48  ;;  %v2800_v45 = vld [vmem:[%s3189_s6 + $0x160] sm:$0xff]  }
  0xc6   : > { %v1317_v3 = vadd.f32 %v1253_v54, %v1121_v49  ;;  %v431_v4 = vmul.f32 %v2276_v56, %v3226_v38  ;;  %v2404_v5 = vunpack.c.h.bf16 %v2815_v47  ;;  %v2467_v9 = vunpack.c.l.bf16 %v2831_v57  ;;  %v2816_v47 = vld [vmem:[%s3189_s6 + $0x1e0] sm:$0xff]  }
  0xc7   : > { %v562_v6 = vmul.f32 %v2339_v61, %v3232_v42  ;;  %v563_v7 = vmul.f32 %v2340_v62, %v3232_v42  ;;  %v694_v8 = vmul.f32 %v2403_v63, %v3238_v46  ;;  %v2468_v12 = vunpack.c.h.bf16 %v2831_v57  ;;  %v2832_v53 = vld [vmem:[%s3189_s6 + $0x260] sm:$0xff]  }
  0xc8   : > { %v2730_v10 = vpack.c.bf16 %v1317_v3, %v1316_v1  ;;  %v695_v11 = vmul.f32 %v2404_v5, %v3238_v46  ;;  %v2531_v13 = vunpack.c.l.bf16 %v2847_v0  ;;  %v826_v19 = vmul.f32 %v2467_v9, %v3243_v50 }
  0xc9   : > { %v594_v16 = vadd.f32 %v562_v6, %v330_v51  ;;  %v595_v17 = vadd.f32 %v563_v7, %v331_v55  ;;  %v726_v18 = vadd.f32 %v694_v8, %v430_v60  ;;  %v827_v21 = vmul.f32 %v2468_v12, %v3243_v50 }
  0xca   : > { %2893 = vst [vmem:[%s3277_s21 + $0x50] sm:$0xff] %v2730_v10   ;;  %v727_v20 = vadd.f32 %v695_v11, %v431_v4  ;;  %v2532_v22 = vunpack.c.h.bf16 %v2847_v0  ;;  %v958_v24 = vmul.f32 %v2531_v13, %v3249_v58  ;;  %v2595_v27 = vunpack.c.l.bf16 %v2863_v14  ;;  %v2848_v0 = vld [vmem:[%s3189_s6 + $0x2e0] sm:$0xff]  }
  0xcb   : > { %v858_v26 = vadd.f32 %v826_v19, %v594_v16  ;;  %v2596_v28 = vunpack.c.h.bf16 %v2863_v14  ;;  %v2659_v29 = vunpack.c.l.bf16 %v2879_v15  ;;  %v859_v23 = vadd.f32 %v827_v21, %v595_v17  ;;  %v2864_v10 = vld [vmem:[%s3189_s6 + $0x360] sm:$0xff]  }
  0xcc   : > { %v959_v31 = vmul.f32 %v2532_v22, %v3249_v58  ;;  %v990_v33 = vadd.f32 %v958_v24, %v726_v18  ;;  %v2660_v34 = vunpack.c.h.bf16 %v2879_v15  ;;  %v1090_v35 = vmul.f32 %v2595_v27, %v3251_v59  ;;  %v2880_v15 = vld [vmem:[%s3189_s6 + $0x3e0] sm:$0xff]  }
  0xcd   : > { %v1091_v36 = vmul.f32 %v2596_v28, %v3251_v59  ;;  %v1222_v37 = vmul.f32 %v2659_v29, %v3257_v2  ;;  %v2215_v39 = vunpack.c.l.bf16 %v2768_v25  ;;  %v2216_v43 = vunpack.c.h.bf16 %v2768_v25  ;;  %v2769_v25 = vld [vmem:[%s3189_s6 + $0x68] sm:$0xff]  }
  0xce   : > { %v991_v40 = vadd.f32 %v959_v31, %v727_v20  ;;  %v1223_v41 = vmul.f32 %v2660_v34, %v3257_v2  ;;  %v2279_v44 = vunpack.c.l.bf16 %v2784_v30  ;;  %v1122_v48 = vadd.f32 %v1090_v35, %v858_v26 }
  0xcf   : > { %v1123_v49 = vadd.f32 %v1091_v36, %v859_v23  ;;  %v1254_v51 = vadd.f32 %v1222_v37, %v990_v33  ;;  %v332_v52 = vmul.f32 %v2215_v39, %v3220_v32  ;;  %v333_v55 = vmul.f32 %v2216_v43, %v3220_v32 }
  0xd0   : > { %v1255_v54 = vadd.f32 %v1223_v41, %v991_v40  ;;  %v2280_v56 = vunpack.c.h.bf16 %v2784_v30  ;;  %v432_v57 = vmul.f32 %v2279_v44, %v3226_v38  ;;  %v2343_v61 = vunpack.c.l.bf16 %v2800_v45  ;;  %v2785_v30 = vld [vmem:[%s3189_s6 + $0xe8] sm:$0xff]  }
  0xd1   : > { %v1318_v60 = vadd.f32 %v1254_v51, %v1122_v48  ;;  %v2344_v62 = vunpack.c.h.bf16 %v2800_v45  ;;  %v2407_v63 = vunpack.c.l.bf16 %v2816_v47  ;;  %v2408_v4 = vunpack.c.h.bf16 %v2816_v47  ;;  %v2801_v40 = vld [vmem:[%s3189_s6 + $0x168] sm:$0xff]  }
  0xd2   : > { %v1319_v1 = vadd.f32 %v1255_v54, %v1123_v49  ;;  %v433_v3 = vmul.f32 %v2280_v56, %v3226_v38  ;;  %v2471_v5 = vunpack.c.l.bf16 %v2832_v53  ;;  %v564_v6 = vmul.f32 %v2343_v61, %v3232_v42  ;;  %v2817_v47 = vld [vmem:[%s3189_s6 + $0x1e8] sm:$0xff]  }
  0xd3   : > { %v565_v7 = vmul.f32 %v2344_v62, %v3232_v42  ;;  %v696_v8 = vmul.f32 %v2407_v63, %v3238_v46  ;;  %v2472_v9 = vunpack.c.h.bf16 %v2832_v53  ;;  %v697_v12 = vmul.f32 %v2408_v4, %v3238_v46  ;;  %v2833_v53 = vld [vmem:[%s3189_s6 + $0x268] sm:$0xff]  }
  0xd4   : > { %v2735_v11 = vpack.c.bf16 %v1319_v1, %v1318_v60  ;;  %v828_v13 = vmul.f32 %v2471_v5, %v3243_v50  ;;  %v2535_v14 = vunpack.c.l.bf16 %v2848_v0  ;;  %v596_v16 = vadd.f32 %v564_v6, %v332_v52 }
  0xd5   : > { %v597_v17 = vadd.f32 %v565_v7, %v333_v55  ;;  %v728_v18 = vadd.f32 %v696_v8, %v432_v57  ;;  %v829_v19 = vmul.f32 %v2472_v9, %v3243_v50  ;;  %v729_v20 = vadd.f32 %v697_v12, %v433_v3 }
  0xd6   : > { %2894 = vst [vmem:[%s3277_s21 + $0x58] sm:$0xff] %v2735_v11   ;;  %v2536_v21 = vunpack.c.h.bf16 %v2848_v0  ;;  %v960_v22 = vmul.f32 %v2535_v14, %v3249_v58  ;;  %v2599_v24 = vunpack.c.l.bf16 %v2864_v10  ;;  %v860_v26 = vadd.f32 %v828_v13, %v596_v16  ;;  %v2849_v0 = vld [vmem:[%s3189_s6 + $0x2e8] sm:$0xff]  }
  0xd7   : > { %v861_v27 = vadd.f32 %v829_v19, %v597_v17  ;;  %v2600_v28 = vunpack.c.h.bf16 %v2864_v10  ;;  %v2663_v29 = vunpack.c.l.bf16 %v2880_v15  ;;  %v2664_v34 = vunpack.c.h.bf16 %v2880_v15  ;;  %v2865_v10 = vld [vmem:[%s3189_s6 + $0x368] sm:$0xff]  }
  0xd8   : > { %v961_v23 = vmul.f32 %v2536_v21, %v3249_v58  ;;  %v992_v31 = vadd.f32 %v960_v22, %v728_v18  ;;  %v1092_v33 = vmul.f32 %v2599_v24, %v3251_v59  ;;  %v2219_v37 = vunpack.c.l.bf16 %v2769_v25  ;;  %v2881_v15 = vld [vmem:[%s3189_s6 + $0x3e8] sm:$0xff]  }
  0xd9   : > { %v1093_v35 = vmul.f32 %v2600_v28, %v3251_v59  ;;  %v1224_v36 = vmul.f32 %v2663_v29, %v3257_v2  ;;  %v2220_v39 = vunpack.c.h.bf16 %v2769_v25  ;;  %v1225_v44 = vmul.f32 %v2664_v34, %v3257_v2 }
  0xda   : > { %v993_v41 = vadd.f32 %v961_v23, %v729_v20  ;;  %v1124_v43 = vadd.f32 %v1092_v33, %v860_v26  ;;  %v2283_v45 = vunpack.c.l.bf16 %v2785_v30  ;;  %v334_v51 = vmul.f32 %v2219_v37, %v3220_v32  ;;  %v2770_v20 = vld [vmem:[%s3189_s6 + $0x70] sm:$0xff]  }
  0xdb   : > { %v1125_v48 = vadd.f32 %v1093_v35, %v861_v27  ;;  %v1256_v49 = vadd.f32 %v1224_v36, %v992_v31  ;;  %v335_v52 = vmul.f32 %v2220_v39, %v3220_v32  ;;  %v2284_v55 = vunpack.c.h.bf16 %v2785_v30  ;;  %v2786_v30 = vld [vmem:[%s3189_s6 + $0xf0] sm:$0xff]  }
  0xdc   : > { %v1257_v54 = vadd.f32 %v1225_v44, %v993_v41  ;;  %v434_v56 = vmul.f32 %v2283_v45, %v3226_v38  ;;  %v2347_v57 = vunpack.c.l.bf16 %v2801_v40  ;;  %v2348_v61 = vunpack.c.h.bf16 %v2801_v40  ;;  %v2802_v40 = vld [vmem:[%s3189_s6 + $0x170] sm:$0xff]  }
  0xdd   : > { %v1320_v60 = vadd.f32 %v1256_v49, %v1124_v43  ;;  %v2411_v62 = vunpack.c.l.bf16 %v2817_v47  ;;  %v2412_v63 = vunpack.c.h.bf16 %v2817_v47  ;;  %v435_v3 = vmul.f32 %v2284_v55, %v3226_v38  ;;  %v2818_v47 = vld [vmem:[%s3189_s6 + $0x1f0] sm:$0xff]  }
  0xde   : > { %v1321_v1 = vadd.f32 %v1257_v54, %v1125_v48  ;;  %v566_v4 = vmul.f32 %v2347_v57, %v3232_v42  ;;  %v2475_v5 = vunpack.c.l.bf16 %v2833_v53  ;;  %v567_v6 = vmul.f32 %v2348_v61, %v3232_v42 }
  0xdf   : > { %v698_v7 = vmul.f32 %v2411_v62, %v3238_v46  ;;  %v699_v8 = vmul.f32 %v2412_v63, %v3238_v46  ;;  %v2476_v9 = vunpack.c.h.bf16 %v2833_v53  ;;  %v2539_v14 = vunpack.c.l.bf16 %v2849_v0  ;;  %v2834_v53 = vld [vmem:[%s3189_s6 + $0x270] sm:$0xff]  }
  0xe0   : > { %v2740_v11 = vpack.c.bf16 %v1321_v1, %v1320_v60  ;;  %v598_v12 = vadd.f32 %v566_v4, %v334_v51  ;;  %v830_v13 = vmul.f32 %v2475_v5, %v3243_v50  ;;  %v599_v16 = vadd.f32 %v567_v6, %v335_v52  ;;  %v2850_v60 = vld [vmem:[%s3189_s6 + $0x2f0] sm:$0xff]  }
  0xe1   : > { %v730_v17 = vadd.f32 %v698_v7, %v434_v56  ;;  %v731_v18 = vadd.f32 %v699_v8, %v435_v3  ;;  %v831_v19 = vmul.f32 %v2476_v9, %v3243_v50  ;;  %v2540_v22 = vunpack.c.h.bf16 %v2849_v0 }
  0xe2   : > { %2895 = vst [vmem:[%s3277_s21 + $0x60] sm:$0xff] %v2740_v11   ;;  %v862_v21 = vadd.f32 %v830_v13, %v598_v12  ;;  %v962_v24 = vmul.f32 %v2539_v14, %v3249_v58  ;;  %v2603_v25 = vunpack.c.l.bf16 %v2865_v10  ;;  %v2604_v27 = vunpack.c.h.bf16 %v2865_v10  ;;  %v2866_v10 = vld [vmem:[%s3189_s6 + $0x370] sm:$0xff]  }
  0xe3   : > { %v863_v26 = vadd.f32 %v831_v19, %v599_v16  ;;  %v2667_v28 = vunpack.c.l.bf16 %v2881_v15  ;;  %v2668_v29 = vunpack.c.h.bf16 %v2881_v15  ;;  %v963_v23 = vmul.f32 %v2540_v22, %v3249_v58  ;;  %v2882_v15 = vld [vmem:[%s3189_s6 + $0x3f0] sm:$0xff]  }
  0xe4   : > { %v994_v31 = vadd.f32 %v962_v24, %v730_v17  ;;  %v1094_v33 = vmul.f32 %v2603_v25, %v3251_v59  ;;  %v2223_v34 = vunpack.c.l.bf16 %v2770_v20  ;;  %v1095_v35 = vmul.f32 %v2604_v27, %v3251_v59 }
  0xe5   : > { %v1226_v36 = vmul.f32 %v2667_v28, %v3257_v2  ;;  %v1227_v37 = vmul.f32 %v2668_v29, %v3257_v2  ;;  %v2224_v39 = vunpack.c.h.bf16 %v2770_v20  ;;  %v995_v41 = vadd.f32 %v963_v23, %v731_v18  ;;  %v2771_v20 = vld [vmem:[%s3189_s6 + $0x78] sm:$0xff]  }
  0xe6   : > { %v1126_v43 = vadd.f32 %v1094_v33, %v862_v21  ;;  %v336_v44 = vmul.f32 %v2223_v34, %v3220_v32  ;;  %v2287_v45 = vunpack.c.l.bf16 %v2786_v30  ;;  %v1127_v48 = vadd.f32 %v1095_v35, %v863_v26 }
  0xe7   : > { %v1258_v49 = vadd.f32 %v1226_v36, %v994_v31  ;;  %v337_v51 = vmul.f32 %v2224_v39, %v3220_v32  ;;  %v2288_v52 = vunpack.c.h.bf16 %v2786_v30  ;;  %v1259_v54 = vadd.f32 %v1227_v37, %v995_v41  ;;  %v2787_v30 = vld [vmem:[%s3189_s6 + $0xf8] sm:$0xff]  }
  0xe8   : > { %v436_v55 = vmul.f32 %v2287_v45, %v3226_v38  ;;  %v2351_v56 = vunpack.c.l.bf16 %v2802_v40  ;;  %v2352_v57 = vunpack.c.h.bf16 %v2802_v40  ;;  %v2415_v63 = vunpack.c.l.bf16 %v2818_v47  ;;  %v2803_v40 = vld [vmem:[%s3189_s6 + $0x178] sm:$0xff]  }
  0xe9   : > { %v1322_v61 = vadd.f32 %v1258_v49, %v1126_v43  ;;  %v437_v62 = vmul.f32 %v2288_v52, %v3226_v38  ;;  %v2416_v0 = vunpack.c.h.bf16 %v2818_v47  ;;  %v1323_v1 = vadd.f32 %v1259_v54, %v1127_v48  ;;  %v2819_v41 = vld [vmem:[%s3189_s6 + $0x1f8] sm:$0xff]  }
  0xea   : > { %v568_v3 = vmul.f32 %v2351_v56, %v3232_v42  ;;  %v569_v4 = vmul.f32 %v2352_v57, %v3232_v42  ;;  %v2479_v5 = vunpack.c.l.bf16 %v2834_v53  ;;  %v700_v6 = vmul.f32 %v2415_v63, %v3238_v46 }
  0xeb   : > { %v701_v7 = vmul.f32 %v2416_v0, %v3238_v46  ;;  %v2480_v8 = vunpack.c.h.bf16 %v2834_v53  ;;  %v2543_v9 = vunpack.c.l.bf16 %v2850_v60  ;;  %v2745_v11 = vpack.c.bf16 %v1323_v1, %v1322_v61  ;;  %v2835_v53 = vld [vmem:[%s3189_s6 + $0x278] sm:$0xff]  }
  0xec   : > { %v600_v12 = vadd.f32 %v568_v3, %v336_v44  ;;  %v601_v13 = vadd.f32 %v569_v4, %v337_v51  ;;  %v832_v14 = vmul.f32 %v2479_v5, %v3243_v50  ;;  %v732_v16 = vadd.f32 %v700_v6, %v436_v55 }
  0xed   : > { %v733_v17 = vadd.f32 %v701_v7, %v437_v62  ;;  %v833_v18 = vmul.f32 %v2480_v8, %v3243_v50  ;;  %v2544_v19 = vunpack.c.h.bf16 %v2850_v60  ;;  %2896 = vst [vmem:[%s3277_s21 + $0x68] sm:$0xff] %v2745_v11   ;;  %v964_v22 = vmul.f32 %v2543_v9, %v3249_v58  ;;  %v2851_v60 = vld [vmem:[%s3189_s6 + $0x2f8] sm:$0xff]  }
  0xee   : > { %v864_v21 = vadd.f32 %v832_v14, %v600_v12  ;;  %v2607_v24 = vunpack.c.l.bf16 %v2866_v10  ;;  %v2608_v25 = vunpack.c.h.bf16 %v2866_v10  ;;  %v2671_v28 = vunpack.c.l.bf16 %v2882_v15  ;;  %v2867_v9 = vld [vmem:[%s3189_s6 + $0x378] sm:$0xff]  }
  0xef   : > { %v865_v26 = vadd.f32 %v833_v18, %v601_v13  ;;  %v965_v27 = vmul.f32 %v2544_v19, %v3249_v58  ;;  %v2672_v29 = vunpack.c.h.bf16 %v2882_v15  ;;  %v996_v23 = vadd.f32 %v964_v22, %v732_v16  ;;  %v2883_v10 = vld [vmem:[%s3189_s6 + $0x3f8] sm:$0xff]  }
  0xf0   : > { %v1096_v31 = vmul.f32 %v2607_v24, %v3251_v59  ;;  %v1097_v33 = vmul.f32 %v2608_v25, %v3251_v59  ;;  %v2227_v34 = vunpack.c.l.bf16 %v2771_v20  ;;  %v1228_v36 = vmul.f32 %v2671_v28, %v3257_v2 }
  0xf1   : > { %v997_v35 = vadd.f32 %v965_v27, %v733_v17  ;;  %v1229_v37 = vmul.f32 %v2672_v29, %v3257_v2  ;;  %v2228_v39 = vunpack.c.h.bf16 %v2771_v20  ;;  %v2291_v47 = vunpack.c.l.bf16 %v2787_v30 }
  0xf2   : > { %v1128_v43 = vadd.f32 %v1096_v31, %v864_v21  ;;  %v1129_v44 = vadd.f32 %v1097_v33, %v865_v26  ;;  %v338_v45 = vmul.f32 %v2227_v34, %v3220_v32  ;;  %v1260_v48 = vadd.f32 %v1228_v36, %v996_v23  ;;  %v1621_v36 = vld [vmem:[%s3277_s21 + $0xc] sm:$0xf] (%p3736_p3) }
  0xf3   : > { %v1261_v49 = vadd.f32 %v1229_v37, %v997_v35  ;;  %v339_v51 = vmul.f32 %v2228_v39, %v3220_v32  ;;  %v2292_v52 = vunpack.c.h.bf16 %v2787_v30  ;;  %v438_v54 = vmul.f32 %v2291_v47, %v3226_v38  ;;  %v1623_v37 = vld [vmem:[%s3277_s21 + $0x10] sm:$0xf] (%p3736_p3)  ;;  %1622 = vst [vmem:[%s3641_s28 + $0x18] sm:$0xf] (%p3736_p3), %v1621_v36  ;;  %v1625_v39 = vld [vmem:[%s3277_s21 + $0x14] sm:$0xf] (%p3736_p3) }
  0xf4   : > { %v2355_v55 = vunpack.c.l.bf16 %v2803_v40  ;;  %v2356_v56 = vunpack.c.h.bf16 %v2803_v40  ;;  %v2419_v57 = vunpack.c.l.bf16 %v2819_v41  ;;  %v1324_v61 = vadd.f32 %v1260_v48, %v1128_v43  ;;  %1624 = vst [vmem:[%s3641_s28 + $0x20] sm:$0xf] (%p3736_p3), %v1623_v37  ;;  %v1627_v40 = vld [vmem:[%s3277_s21 + $0x18] sm:$0xf] (%p3736_p3)  ;;  %1626 = vst [vmem:[%s3641_s28 + $0x28] sm:$0xf] (%p3736_p3), %v1625_v39 }
  0xf5   : > { %v1325_v62 = vadd.f32 %v1261_v49, %v1129_v44  ;;  %v439_v63 = vmul.f32 %v2292_v52, %v3226_v38  ;;  %v2420_v0 = vunpack.c.h.bf16 %v2819_v41  ;;  %v2483_v4 = vunpack.c.l.bf16 %v2835_v53  ;;  %v1629_v41 = vld [vmem:[%s3277_s21 + $0x1c] sm:$0xf] (%p3736_p3)  ;;  %1628 = vst [vmem:[%s3641_s28 + $0x30] sm:$0xf] (%p3736_p3), %v1627_v40  ;;  %v1631_v43 = vld [vmem:[%s3277_s21 + $0x20] sm:$0xf] (%p3736_p3) }
  0xf6   : > { %v570_v1 = vmul.f32 %v2355_v55, %v3232_v42  ;;  %v571_v32 = vmul.f32 %v2356_v56, %v3232_v42  ;;  %v702_v3 = vmul.f32 %v2419_v57, %v3238_v46  ;;  %v2484_v7 = vunpack.c.h.bf16 %v2835_v53  ;;  %1630 = vst [vmem:[%s3641_s28 + $0x38] sm:$0xf] (%p3736_p3), %v1629_v41  ;;  %v1633_v44 = vld [vmem:[%s3277_s21 + $0x24] sm:$0xf] (%p3736_p3)  ;;  %1632 = vst [vmem:[%s3641_s28 + $0x40] sm:$0xf] (%p3736_p3), %v1631_v43 }
  0xf7   : > { %v2750_v5 = vpack.c.bf16 %v1325_v62, %v1324_v61  ;;  %v703_v6 = vmul.f32 %v2420_v0, %v3238_v46  ;;  %v2547_v8 = vunpack.c.l.bf16 %v2851_v60  ;;  %v834_v38 = vmul.f32 %v2483_v4, %v3243_v50  ;;  %1634 = vst [vmem:[%s3641_s28 + $0x48] sm:$0xf] (%p3736_p3), %v1633_v44  ;;  %v1637_v47 = vld [vmem:[%s3277_s21 + $0x2c] sm:$0xf] (%p3736_p3)  ;;  %v1639_v48 = vld [vmem:[%s3277_s21 + $0x30] sm:$0xf] (%p3736_p3) }
  0xf8   : > { %v602_v11 = vadd.f32 %v570_v1, %v338_v45  ;;  %v603_v12 = vadd.f32 %v571_v32, %v339_v51  ;;  %v734_v13 = vadd.f32 %v702_v3, %v438_v54  ;;  %v835_v15 = vmul.f32 %v2484_v7, %v3243_v50  ;;  %v1635_v45 = vld [vmem:[%s3277_s21 + $0x28] sm:$0xf] (%p3736_p3)  ;;  %v1641_v49 = vld [vmem:[%s3277_s21 + $0x34] sm:$0xf] (%p3736_p3)  ;;  %1638 = vst [vmem:[%s3641_s28 + $0x58] sm:$0xf] (%p3736_p3), %v1637_v47 }
  0xf9   : > { %2897 = vst [vmem:[%s3277_s21 + $0x70] sm:$0xff] %v2750_v5   ;;  %v735_v14 = vadd.f32 %v703_v6, %v439_v63  ;;  %v2548_v42 = vunpack.c.h.bf16 %v2851_v60  ;;  %v966_v16 = vmul.f32 %v2547_v8, %v3249_v58  ;;  %v2611_v18 = vunpack.c.l.bf16 %v2867_v9  ;;  %1636 = vst [vmem:[%s3641_s28 + $0x50] sm:$0xf] (%p3736_p3), %v1635_v45  ;;  %v1643_v51 = vld [vmem:[%s3277_s21 + $0x38] sm:$0xf] (%p3736_p3) }
  0xfa   : > { %v866_v17 = vadd.f32 %v834_v38, %v602_v11  ;;  %v2612_v19 = vunpack.c.h.bf16 %v2867_v9  ;;  %v2675_v46 = vunpack.c.l.bf16 %v2883_v10  ;;  %v867_v20 = vadd.f32 %v835_v15, %v603_v12  ;;  %1640 = vst [vmem:[%s3641_s28 + $0x60] sm:$0xf] (%p3736_p3), %v1639_v48  ;;  %1642 = vst [vmem:[%s3641_s28 + $0x68] sm:$0xf] (%p3736_p3), %v1641_v49  ;;  %v1645_v52 = vld [vmem:[%s3277_s21 + $0x3c] sm:$0xf] (%p3736_p3) }
  0xfb   : > { %v967_v21 = vmul.f32 %v2548_v42, %v3249_v58  ;;  %v998_v22 = vadd.f32 %v966_v16, %v734_v13  ;;  %v2676_v24 = vunpack.c.h.bf16 %v2883_v10  ;;  %v1098_v25 = vmul.f32 %v2611_v18, %v3251_v59  ;;  %v1615_v58 = vld [vmem:[%s3277_s21] sm:$0xf] (%p3736_p3)  ;;  %1644 = vst [vmem:[%s3641_s28 + $0x70] sm:$0xf] (%p3736_p3), %v1643_v51  ;;  %1646 = vst [vmem:[%s3641_s28 + $0x78] sm:$0xf] (%p3736_p3), %v1645_v52 }
  0xfc   : > { %v1099_v26 = vmul.f32 %v2612_v19, %v3251_v59  ;;  %v1230_v27 = vmul.f32 %v2675_v46, %v3257_v2  ;;  %v1617_v59 = vld [vmem:[%s3277_s21 + $0x4] sm:$0xf] (%p3736_p3)  ;;  %1616 = vst [vmem:[%s3641_s28] sm:$0xf] (%p3736_p3), %v1615_v58  ;;  %v1647_v53 = vld [vmem:[%s3277_s21 + $0x40] sm:$0xf] (%p3736_p3) }
  0xfd   : > { %v999_v50 = vadd.f32 %v967_v21, %v735_v14  ;;  %v1231_v28 = vmul.f32 %v2676_v24, %v3257_v2  ;;  %v1130_v29 = vadd.f32 %v1098_v25, %v866_v17  ;;  %v1619_v2 = vld [vmem:[%s3277_s21 + $0x8] sm:$0xf] (%p3736_p3)  ;;  %1618 = vst [vmem:[%s3641_s28 + $0x8] sm:$0xf] (%p3736_p3), %v1617_v59  ;;  %1648 = vst [vmem:[%s3641_s28 + $0x80] sm:$0xf] (%p3736_p3), %v1647_v53 }
  0xfe   : > { %v1131_v30 = vadd.f32 %v1099_v26, %v867_v20  ;;  %v1262_v23 = vadd.f32 %v1230_v27, %v998_v22  ;;  %1620 = vst [vmem:[%s3641_s28 + $0x10] sm:$0xf] (%p3736_p3), %v1619_v2  ;;  %v1649_v54 = vld [vmem:[%s3277_s21 + $0x44] sm:$0xf] (%p3736_p3)  ;;  %v1651_v55 = vld [vmem:[%s3277_s21 + $0x48] sm:$0xf] (%p3736_p3) }
  0xff   : > { %v1263_v31 = vadd.f32 %v1231_v28, %v999_v50  ;;  %v1653_v56 = vld [vmem:[%s3277_s21 + $0x4c] sm:$0xf] (%p3736_p3)  ;;  %1650 = vst [vmem:[%s3641_s28 + $0x88] sm:$0xf] (%p3736_p3), %v1649_v54  ;;  %1652 = vst [vmem:[%s3641_s28 + $0x90] sm:$0xf] (%p3736_p3), %v1651_v55 }
 0x100   : > { %v1326_v33 = vadd.f32 %v1262_v23, %v1130_v29  ;;  %1654 = vst [vmem:[%s3641_s28 + $0x98] sm:$0xf] (%p3736_p3), %v1653_v56  ;;  %v1655_v57 = vld [vmem:[%s3277_s21 + $0x50] sm:$0xf] (%p3736_p3)  ;;  %v1657_v60 = vld [vmem:[%s3277_s21 + $0x54] sm:$0xf] (%p3736_p3) }
 0x101   : > { %v1327_v34 = vadd.f32 %v1263_v31, %v1131_v30  ;;  %1593 = sbr.rel (!%p3736_p3) target bundleno = 270 (0x10e), region = 48  ;;  %v1659_v61 = vld [vmem:[%s3277_s21 + $0x58] sm:$0xf] (%p3736_p3)  ;;  %1656 = vst [vmem:[%s3641_s28 + $0xa0] sm:$0xf] (%p3736_p3), %v1655_v57 }
 0x102   : > { %1658 = vst [vmem:[%s3641_s28 + $0xa8] sm:$0xf] (%p3736_p3), %v1657_v60  ;;  %1660 = vst [vmem:[%s3641_s28 + $0xb0] sm:$0xf] (%p3736_p3), %v1659_v61  ;;  %v1661_v62 = vld [vmem:[%s3277_s21 + $0x5c] sm:$0xf] (%p3736_p3) }
 0x103   : > { %v2755_v35 = vpack.c.bf16 %v1327_v34, %v1326_v33  ;;  %v1663_v63 = vld [vmem:[%s3277_s21 + $0x60] sm:$0xf] (%p3736_p3)  ;;  %v1665_v0 = vld [vmem:[%s3277_s21 + $0x64] sm:$0xf] (%p3736_p3)  ;;  %1662 = vst [vmem:[%s3641_s28 + $0xb8] sm:$0xf] (%p3736_p3), %v1661_v62 }
 0x104   : > { %1664 = vst [vmem:[%s3641_s28 + $0xc0] sm:$0xf] (%p3736_p3), %v1663_v63  ;;  %1666 = vst [vmem:[%s3641_s28 + $0xc8] sm:$0xf] (%p3736_p3), %v1665_v0  ;;  %v1667_v1 = vld [vmem:[%s3277_s21 + $0x68] sm:$0xf] (%p3736_p3) }
 0x105   : > { %2898 = vst [vmem:[%s3277_s21 + $0x78] sm:$0xff] %v2755_v35   ;;  %v1669_v32 = vld [vmem:[%s3277_s21 + $0x6c] sm:$0xf] (%p3736_p3)  ;;  %v1671_v3 = vld [vmem:[%s3277_s21 + $0x70] sm:$0xf] (%p3736_p3) }
 0x106   : > { %1668 = vst [vmem:[%s3641_s28 + $0xd0] sm:$0xf] %v1667_v1  ;;  %1670 = vst [vmem:[%s3641_s28 + $0xd8] sm:$0xf] %v1669_v32  ;;  %v1673_v4 = vld [vmem:[%s3277_s21 + $0x74] sm:$0xf] }
 0x107   : > { %1672 = vst [vmem:[%s3641_s28 + $0xe0] sm:$0xf] %v1671_v3  ;;  %1674 = vst [vmem:[%s3641_s28 + $0xe8] sm:$0xf] %v1673_v4 }
 0x10c   : > { %v1675_v5 = vld [vmem:[%s3277_s21 + $0x78] sm:$0xf]  ;;  %v1677_v6 = vld [vmem:[%s3277_s21 + $0x7c] sm:$0xf] }
 0x10d   : > { %1676 = vst [vmem:[%s3641_s28 + $0xf0] sm:$0xf] %v1675_v5  ;;  %1678 = vst [vmem:[%s3641_s28 + $0xf8] sm:$0xf] %v1677_v6 }
 0x10e PF: > { %s16_s14 = sadd.s32 1, %s3065_s14   ;;  %s3737_s9 = smov %s3049_s10 }
 0x10f   : > { %p13_p9 = scmp.ge.s32.totalorder %s16_s14, 4   ;;  %s3738_s10 = smov %s3053_s11 }
 0x110   : > { %s3739_s11 = smov %s3172_s15  ;;  %s3740_s12 = smov %s3061_s13 }
 0x111   : > { %s3741_s13 = smov %s3743_s29  ;;  %15 = sbr.rel (!%p13_p9) target bundleno = 5 (0x5), region = 129 }
 0x116   :  { %1776 = vsyncpa [#allocation4], 1 }
 0x117   :  { %1778 = vsyncpa [#allocation4 + $0x1], 1 }
 0x118   :  { %1779 = vsyncpa [#allocation5], 1 }
 0x119   :  { %1781 = vsyncpa [#allocation5 + $0x1], 1 }

</bundles_post_ra>
